<compile_context>
chip_gen: v5e
topology: v5e:2x2
jax: 0.10.0
libtpu: 0.0.40
codegen_flags: <defaults>
</compile_context>

<pallas_src>
import functools

import jax
import jax.numpy as jnp
from jax.experimental import pallas as pl
from jax.experimental.pallas import tpu as pltpu


def _round_up(v, m):
    return ((v + m - 1) // m) * m


def _mlp_softmax_kernel(x_ref, w_ref, b_ref, o_ref, *, n_real_out, compute_dtype):
    # x_ref: (TB, P) compute_dtype ; w_ref: (4, P, P) compute_dtype ;
    # b_ref: (4, 1, P) f32 ; o_ref: (TB, P) f32
    h = x_ref[...]

    # Three (Linear -> ReLU -> Dropout[eval=identity]) blocks.
    for layer in range(3):
        z = jnp.dot(h, w_ref[layer], preferred_element_type=jnp.float32) + b_ref[layer]
        h = jnp.maximum(z, 0.0).astype(compute_dtype)

    logits = jnp.dot(h, w_ref[3], preferred_element_type=jnp.float32) + b_ref[3]

    # Mask padded output columns so they do not contribute to the softmax.
    col = jax.lax.broadcasted_iota(jnp.int32, logits.shape, dimension=1)
    logits = jnp.where(col < n_real_out, logits, -jnp.inf)

    # Numerically stable softmax over dim=1; divide via EUP reciprocal.
    m = jnp.max(logits, axis=1, keepdims=True)
    e = jnp.exp(logits - m)
    denom = jnp.sum(e, axis=1, keepdims=True)
    o_ref[...] = (e * pl.reciprocal(denom, approx=False)).astype(o_ref.dtype)


def classification_model_forward(x, params, *, block_b=256, compute_dtype=jnp.float32):
    """x: [B, input_size] f32. params: w{1..4} as (in,out), b{1..4} as (1,out)."""
    B, input_size = x.shape
    dims = [params["w1"].shape[0], params["w1"].shape[1], params["w2"].shape[1],
            params["w3"].shape[1], params["w4"].shape[1]]
    output_size = dims[-1]
    P = max(_round_up(d, 128) for d in dims)      # single lane-dense padded width

    # Pack parameters into two pre-padded slabs (weights in matmul dtype, biases f32).
    w_slab = jnp.zeros((4, P, P), compute_dtype)
    b_slab = jnp.zeros((4, 1, P), jnp.float32)
    for idx in range(4):
        w = params[f"w{idx + 1}"]
        b = params[f"b{idx + 1}"]
        w_slab = w_slab.at[idx, : w.shape[0], : w.shape[1]].set(w.astype(compute_dtype))
        b_slab = b_slab.at[idx, :, : b.shape[1]].set(b.astype(jnp.float32))

    # Batch tiling: pad B up to a multiple of the (8-aligned) tile.
    tb = min(block_b, _round_up(B, 8))
    Bp = _round_up(B, tb)
    xp = jnp.zeros((Bp, P), compute_dtype)
    xp = xp.at[:B, :input_size].set(x.astype(compute_dtype))

    kernel = functools.partial(
        _mlp_softmax_kernel, n_real_out=output_size, compute_dtype=compute_dtype)

    out_padded = pl.pallas_call(
        kernel,
        out_shape=jax.ShapeDtypeStruct((Bp, P), jnp.float32),
        grid=(Bp // tb,),
        in_specs=[
            pl.BlockSpec((tb, P), lambda i: (i, 0)),        # batch tile of x
            pl.BlockSpec((4, P, P), lambda i: (0, 0, 0)),   # weights stay resident
            pl.BlockSpec((4, 1, P), lambda i: (0, 0, 0)),   # biases stay resident
        ],
        out_specs=pl.BlockSpec((tb, P), lambda i: (i, 0)),
        compiler_params=pltpu.CompilerParams(
            dimension_semantics=("parallel",)),
    )(xp, w_slab, b_slab)

    return out_padded[:B, :output_size]


def init_params(key, input_size, hidden_size, output_size):
    """Deterministic init. PyTorch Linear weight is (out,in); we store (in,out)."""
    dims = [input_size] + list(hidden_size) + [output_size]
    params = {}
    for idx in range(4):
        fan_in, fan_out = dims[idx], dims[idx + 1]
        key, kw, kb = jax.random.split(key, 3)
        bound = 1.0 / jnp.sqrt(fan_in)
        params[f"w{idx + 1}"] = jax.random.uniform(
            kw, (fan_in, fan_out), jnp.float32, -bound, bound)
        params[f"b{idx + 1}"] = jax.random.uniform(
            kb, (1, fan_out), jnp.float32, -bound, bound)
    return params


def reference_forward(x, params):
    h = x
    for idx in range(1, 4):
        h = jnp.maximum(h @ params[f"w{idx}"] + params[f"b{idx}"], 0.0)
    logits = h @ params["w4"] + params["b4"]
    return jax.nn.softmax(logits, axis=1)


if __name__ == "__main__":
    key = jax.random.PRNGKey(0)

    B = 384                       # exercises grid=(2,) with a padded final tile (TB=256)
    input_size = 32
    hidden_size = (64, 48, 32)
    output_size = 10

    key, kx = jax.random.split(key)
    x = jax.random.normal(kx, (B, input_size), jnp.float32)
    params = init_params(key, input_size, hidden_size, output_size)

    # f32 matmul path (exact check vs reference).
    out = classification_model_forward(x, params)
    out = jax.block_until_ready(out)

    ref = reference_forward(x, params)
    assert out.shape == (B, output_size)
    assert jnp.allclose(out, ref, atol=1e-5, rtol=1e-5), "f32 mismatch vs reference"
    assert jnp.allclose(jnp.sum(out, axis=1), 1.0, atol=1e-5), "softmax rows must sum to 1"

    # bf16 matmul-operand path (v6e/v7x fast path); looser tolerance.
    out_bf16 = classification_model_forward(x, params, compute_dtype=jnp.bfloat16)
    out_bf16 = jax.block_until_ready(out_bf16)
    assert out_bf16.shape == (B, output_size)
    assert jnp.all(jnp.isfinite(out_bf16)), "bf16 path produced non-finite values"
    assert jnp.allclose(out_bf16, ref, atol=5e-2), "bf16 mismatch vs reference"
    assert jnp.allclose(jnp.sum(out_bf16, axis=1), 1.0, atol=1e-3), "bf16 rows must sum to 1"

    print("KERNEL_OK")
</pallas_src>

<mosaic_0001>
module attributes {stable_mosaic.version = 11 : i64} {
  func.func @_mlp_softmax_kernel(%arg0: i32, %arg1: memref<256x128xf32, #tpu.memory_space<vmem>>, %arg2: memref<4x128x128xf32, #tpu.memory_space<vmem>>, %arg3: memref<4x1x128xf32, #tpu.memory_space<vmem>>, %arg4: memref<256x128xf32, #tpu.memory_space<vmem>>) attributes {dimension_semantics = [#tpu.dimension_semantics<parallel>], iteration_bounds = array<i64: 2>, scalar_prefetch = 0 : i64, scratch_operands = 0 : i64, tpu.core_type = #tpu.core_type<tc>, window_params = [{transform_indices = @transform_0, window_bounds = array<i64: 256, 128>}, {pipeline_mode = #tpu.pipeline_mode<synchronous>, transform_indices = @transform_1, window_bounds = array<i64: 4, 128, 128>}, {pipeline_mode = #tpu.pipeline_mode<synchronous>, transform_indices = @transform_2, window_bounds = array<i64: 4, 1, 128>}, {transform_indices = @transform_3, window_bounds = array<i64: 256, 128>}]} {
    %c0 = arith.constant 0 : index
    %c0_0 = arith.constant 0 : index
    %0 = vector.load %arg1[%c0, %c0_0] : memref<256x128xf32, #tpu.memory_space<vmem>>, vector<256x128xf32>
    %c0_1 = arith.constant 0 : index
    %c0_2 = arith.constant 0 : index
    %c0_3 = arith.constant 0 : index
    %1 = vector.load %arg2[%c0_1, %c0_2, %c0_3] : memref<4x128x128xf32, #tpu.memory_space<vmem>>, vector<1x128x128xf32>
    %2 = vector.shape_cast %1 : vector<1x128x128xf32> to vector<128x128xf32>
    %cst = arith.constant dense<0.000000e+00> : vector<256x128xf32>
    %3 = tpu.matmul %0, %2, %cst {dimension_numbers = #tpu.dot_dimension_numbers<[1], [0], [0], [1], [0, 0, 1, 1], [], []>} : vector<256x128xf32>, vector<128x128xf32>, vector<256x128xf32> -> vector<256x128xf32>
    %c0_4 = arith.constant 0 : index
    %c0_5 = arith.constant 0 : index
    %c0_6 = arith.constant 0 : index
    %4 = vector.load %arg3[%c0_4, %c0_5, %c0_6] : memref<4x1x128xf32, #tpu.memory_space<vmem>>, vector<1x1x128xf32>
    %5 = vector.shape_cast %4 : vector<1x1x128xf32> to vector<1x128xf32>
    %6 = vector.broadcast %5 : vector<1x128xf32> to vector<256x128xf32>
    %7 = arith.addf %3, %6 : vector<256x128xf32>
    %cst_7 = arith.constant 0.000000e+00 : f32
    %8 = vector.broadcast %cst_7 : f32 to vector<256x128xf32>
    %9 = arith.maximumf %7, %8 : vector<256x128xf32>
    %c1 = arith.constant 1 : index
    %c0_8 = arith.constant 0 : index
    %c0_9 = arith.constant 0 : index
    %10 = vector.load %arg2[%c1, %c0_8, %c0_9] : memref<4x128x128xf32, #tpu.memory_space<vmem>>, vector<1x128x128xf32>
    %11 = vector.shape_cast %10 : vector<1x128x128xf32> to vector<128x128xf32>
    %cst_10 = arith.constant dense<0.000000e+00> : vector<256x128xf32>
    %12 = tpu.matmul %9, %11, %cst_10 {dimension_numbers = #tpu.dot_dimension_numbers<[1], [0], [0], [1], [0, 0, 1, 1], [], []>} : vector<256x128xf32>, vector<128x128xf32>, vector<256x128xf32> -> vector<256x128xf32>
    %c1_11 = arith.constant 1 : index
    %c0_12 = arith.constant 0 : index
    %c0_13 = arith.constant 0 : index
    %13 = vector.load %arg3[%c1_11, %c0_12, %c0_13] : memref<4x1x128xf32, #tpu.memory_space<vmem>>, vector<1x1x128xf32>
    %14 = vector.shape_cast %13 : vector<1x1x128xf32> to vector<1x128xf32>
    %15 = vector.broadcast %14 : vector<1x128xf32> to vector<256x128xf32>
    %16 = arith.addf %12, %15 : vector<256x128xf32>
    %cst_14 = arith.constant 0.000000e+00 : f32
    %17 = vector.broadcast %cst_14 : f32 to vector<256x128xf32>
    %18 = arith.maximumf %16, %17 : vector<256x128xf32>
    %c2 = arith.constant 2 : index
    %c0_15 = arith.constant 0 : index
    %c0_16 = arith.constant 0 : index
    %19 = vector.load %arg2[%c2, %c0_15, %c0_16] : memref<4x128x128xf32, #tpu.memory_space<vmem>>, vector<1x128x128xf32>
    %20 = vector.shape_cast %19 : vector<1x128x128xf32> to vector<128x128xf32>
    %cst_17 = arith.constant dense<0.000000e+00> : vector<256x128xf32>
    %21 = tpu.matmul %18, %20, %cst_17 {dimension_numbers = #tpu.dot_dimension_numbers<[1], [0], [0], [1], [0, 0, 1, 1], [], []>} : vector<256x128xf32>, vector<128x128xf32>, vector<256x128xf32> -> vector<256x128xf32>
    %c2_18 = arith.constant 2 : index
    %c0_19 = arith.constant 0 : index
    %c0_20 = arith.constant 0 : index
    %22 = vector.load %arg3[%c2_18, %c0_19, %c0_20] : memref<4x1x128xf32, #tpu.memory_space<vmem>>, vector<1x1x128xf32>
    %23 = vector.shape_cast %22 : vector<1x1x128xf32> to vector<1x128xf32>
    %24 = vector.broadcast %23 : vector<1x128xf32> to vector<256x128xf32>
    %25 = arith.addf %21, %24 : vector<256x128xf32>
    %cst_21 = arith.constant 0.000000e+00 : f32
    %26 = vector.broadcast %cst_21 : f32 to vector<256x128xf32>
    %27 = arith.maximumf %25, %26 : vector<256x128xf32>
    %c3 = arith.constant 3 : index
    %c0_22 = arith.constant 0 : index
    %c0_23 = arith.constant 0 : index
    %28 = vector.load %arg2[%c3, %c0_22, %c0_23] : memref<4x128x128xf32, #tpu.memory_space<vmem>>, vector<1x128x128xf32>
    %29 = vector.shape_cast %28 : vector<1x128x128xf32> to vector<128x128xf32>
    %cst_24 = arith.constant dense<0.000000e+00> : vector<256x128xf32>
    %30 = tpu.matmul %27, %29, %cst_24 {dimension_numbers = #tpu.dot_dimension_numbers<[1], [0], [0], [1], [0, 0, 1, 1], [], []>} : vector<256x128xf32>, vector<128x128xf32>, vector<256x128xf32> -> vector<256x128xf32>
    %c3_25 = arith.constant 3 : index
    %c0_26 = arith.constant 0 : index
    %c0_27 = arith.constant 0 : index
    %31 = vector.load %arg3[%c3_25, %c0_26, %c0_27] : memref<4x1x128xf32, #tpu.memory_space<vmem>>, vector<1x1x128xf32>
    %32 = vector.shape_cast %31 : vector<1x1x128xf32> to vector<1x128xf32>
    %33 = vector.broadcast %32 : vector<1x128xf32> to vector<256x128xf32>
    %34 = arith.addf %30, %33 : vector<256x128xf32>
    %35 = tpu.iota {dimensions = array<i32: 1>} : vector<256x128xi32>
    %c10_i32 = arith.constant 10 : i32
    %36 = vector.broadcast %c10_i32 : i32 to vector<256x128xi32>
    %37 = arith.cmpi slt, %35, %36 : vector<256x128xi32>
    %cst_28 = arith.constant 0xFF800000 : f32
    %38 = vector.broadcast %cst_28 : f32 to vector<256x128xf32>
    %39 = arith.select %37, %34, %38 : vector<256x128xi1>, vector<256x128xf32>
    %cst_29 = arith.constant dense<0xFF800000> : vector<256xf32>
    %40 = vector.multi_reduction <maximumf>, %39, %cst_29 [1] : vector<256x128xf32> to vector<256xf32>
    %41 = vector.shape_cast %40 : vector<256xf32> to vector<256x1xf32>
    %42 = vector.broadcast %41 : vector<256x1xf32> to vector<256x128xf32>
    %43 = arith.subf %39, %42 : vector<256x128xf32>
    %44 = math.exp %43 : vector<256x128xf32>
    %cst_30 = arith.constant dense<0.000000e+00> : vector<256xf32>
    %45 = vector.multi_reduction <add>, %44, %cst_30 [1] : vector<256x128xf32> to vector<256xf32>
    %46 = vector.shape_cast %45 : vector<256xf32> to vector<256x1xf32>
    %47 = tpu.reciprocal %46 : vector<256x1xf32> -> vector<256x1xf32>
    %48 = vector.broadcast %47 : vector<256x1xf32> to vector<256x128xf32>
    %49 = arith.mulf %44, %48 : vector<256x128xf32>
    %c0_31 = arith.constant 0 : index
    %c0_32 = arith.constant 0 : index
    %50 = vector.load %arg4[%c0_31, %c0_32] : memref<256x128xf32, #tpu.memory_space<vmem>>, vector<256x128xf32>
    tpu.vector_store %arg4[%c0_31, %c0_32], %49 {strides = array<i32>} : memref<256x128xf32, #tpu.memory_space<vmem>>, vector<256x128xf32>,
    return
  }
  func.func @transform_0(%arg0: i32) -> (i32, i32) {
    %c0_i32 = arith.constant 0 : i32
    %c0_i32_0 = arith.constant 0 : i32
    return %arg0, %c0_i32 : i32, i32
  }
  func.func @transform_1(%arg0: i32) -> (i32, i32, i32) {
    %c0_i32 = arith.constant 0 : i32
    %c0_i32_0 = arith.constant 0 : i32
    %c0_i32_1 = arith.constant 0 : i32
    %c0_i32_2 = arith.constant 0 : i32
    return %c0_i32, %c0_i32_0, %c0_i32_1 : i32, i32, i32
  }
  func.func @transform_2(%arg0: i32) -> (i32, i32, i32) {
    %c0_i32 = arith.constant 0 : i32
    %c0_i32_0 = arith.constant 0 : i32
    %c0_i32_1 = arith.constant 0 : i32
    %c0_i32_2 = arith.constant 0 : i32
    return %c0_i32, %c0_i32_0, %c0_i32_1 : i32, i32, i32
  }
  func.func @transform_3(%arg0: i32) -> (i32, i32) {
    %c0_i32 = arith.constant 0 : i32
    %c0_i32_0 = arith.constant 0 : i32
    return %arg0, %c0_i32 : i32, i32
  }
}

</mosaic_0001>

<bundles_post_ra>
// kernel: tpu_custom_call.1
= control target key start
LH: loop header
LB: loop body
LE: loop exit
PB: predicated region body
PF: predicated region fallthrough
CT: control target
= control target key end

     0   :  { %8 = vsyncpa [#allocation3], 0  ;;  %s2879_s0 = inlined_call_operand.hbm [shape: f32[512,128], index: 0, kind: input, shape index: {}]   ;;  %s2880_s1 = inlined_call_operand.hbm [shape: f32[4,128,128], index: 1, kind: input, shape index: {}]   ;;  %s2881_s2 = inlined_call_operand.hbm [shape: f32[4,1,128], index: 2, kind: input, shape index: {}]   ;;  %s2882_s3 = inlined_call_operand.hbm [shape: f32[512,128], index: 3, kind: output, shape index: {}]  }
   0x1   :  { %10 = vsyncpa [#allocation3 + $0x1], 0 }
   0x2   :  { %11 = vsyncpa [#allocation6], 0 }
   0x3   :  { %12 = vsyncpa [#allocation4], 0 }
   0x4   :  { %14 = vsyncpa [#allocation4 + $0x1], 0  ;;  %s2186_s12 = smov 0   ;;  %s2188_s13 = smov 0  }
   0x5   :  { %s2190_s14 = smov 0   ;;  %s2192_s15 = smov 0  }
   0x6 LB: > { %s2207_s16 = sadd.s32 4294967295, %s2156_s15   ;;  %s1771_s17 = sadd.s32 4294967294, %s2156_s15   ;;  %s2156_s15 = sphi %s2192_s15, %s2892_s15   ;;  %s2152_s14 = sphi %s2190_s14, %s2891_s14   ;;  %s2148_s13 = sphi %s2188_s13, %s2890_s13   ;;  %s2144_s12 = sphi %s2186_s12, %s2889_s12  }
   0x7   : > { %p40_p0 = scmp.ne.s32.totalorder %s2148_s13, %s2144_s12  ;;  %p41_p1 = scmp.eq.s32.totalorder %s2207_s16, 0 }
   0x8   : > { %p106_p2 = scmp.eq.s32.totalorder %s2207_s16, 1  ;;  %p112_p3 = scmp.eq.s32.totalorder %s1771_s17, 1 }
   0x9   : > { %p2216_p4 = por %p41_p1, %p40_p0  ;;  %p1772_p5 = scmp.ge.s32.totalorder %s2156_s15, 1 }
   0xa   : > { %p2221_p6 = por %p112_p3, %p40_p0  ;;  %p119_p7 = scmp.lt.s32.totalorder %s2156_s15, 3 }
   0xb   : > { %s130_s22 = sshll.u32 %s2880_s1, 4  ;;  %s2158_s24 = smov [#allocation5]   ;;  %s131_s22 = int_to_ptr.hbm [resolvable:$true] %s130_s22 }
   0xc   : > { %p2229_p8 = pnand %p1772_p5, %p119_p7  ;;  %s132_s25 = sshll.u32 %s2158_s24, 4  ;;  %s133_s25 = int_to_ptr.vmem [resolvable:$true] %s132_s25 }
   0xd   : > { %s144_s28 = sshll.u32 %s2881_s2, 4  ;;  %s2159_s29 = smov 128   ;;  %s145_s28 = int_to_ptr.hbm [resolvable:$true] %s144_s28 }
   0xe   : > { %p1803_p9 = pneg %p2229_p8  ;;  %s2160_s30 = smov 8  }
   0xf   : > { %s2161_s4 = smov [#allocation7]   ;;  %s2162_s6 = smov 16  }
  0x10   : > { %p1804_p10 = pnand %p1803_p9, %p41_p1  ;;  %s146_s5 = sshll.u32 %s2161_s4, 4  ;;  %s147_s5 = int_to_ptr.vmem [resolvable:$true] %s146_s5 }
  0x11   : > { %s2163_s7 = smov 1   ;;  %s2245_s8 = sadd.s32 1, %s2156_s15  }
  0x12   : > { %1806 = dma.hbm_to_vmem [thread:$0]  (!%p1804_p10), %s131_s22, 8192, %s133_s25, [#allocation6], %s2159_s29, %s2159_s29, %s2160_s30  }
  0x13   : > { %1809 = dma.hbm_to_vmem [thread:$0]  (!%p1804_p10), %s145_s28, 64, %s147_s5, [#allocation6], %s2162_s6, %s2162_s6, %s2163_s7  }
  0x14   : > { %s24_s9 = ssub.s32 %s2156_s15, %s2245_s8  ;;  %s27_s10 = sadd.s32 1, %s2152_s14 }
  0x15   : > { %p25_p12 = scmp.eq.s32.totalorder %s24_s9, 0  ;;  %p34_p13 = scmp.ne.s32.totalorder %s2152_s14, %s2148_s13 }
  0x16   : > { %p35_p0 = scmp.eq.s32.totalorder %s2156_s15, 0  ;;  %p1820_p7 = scmp.lt.s32.totalorder %s2156_s15, 2 }
  0x17   : > { %s2254_s11 = scalar_select %p25_p12, %s2152_s14, %s27_s10  }
  0x18   : > { %p36_p3 = por %p35_p0, %p34_p13  ;;  %p2258_p5 = por %p106_p2, %p34_p13 }
  0x19   : > { %s160_s20 = sand.u32 1, %s2152_s14   ;;  %s1789_s22 = sshll.u32 %s2156_s15, 8 }
  0x1a   : > { %s1776_s21 = sshll.u32 %s160_s20, 8  ;;  %s169_s26 = scalar_lea.hbm %s2879_s0, %s1789_s22 }
  0x1b   : > { %s164_s27 = scalar_lea.vmem [#allocation2], %s1776_s21  ;;  %s170_s4 = sshll.u32 %s169_s26, 4  ;;  %s171_s4 = int_to_ptr.hbm [resolvable:$true] %s170_s4 }
  0x1c   : > { %s172_s28 = sshll.u32 %s164_s27, 4  ;;  %p2268_p9 = pnand %p1820_p7, %p36_p3  ;;  %s173_s28 = int_to_ptr.vmem [resolvable:$true] %s172_s28 }
  0x1d   : > { %s161_s6 = scalar_lea.sflag [#allocation3], %s160_s20  ;;  %s2056_s7 = sshra.s32 %s171_s4, 4  ;;  %s2057_s7 = int_to_ptr.hbm [resolvable:$true] %s2056_s7 }
  0x1e   : > { %s2058_s9 = scalar_lea.hbm %s2057_s7, 256  ;;  %p2060_p10 = pneg %p2268_p9 }
  0x1f   : > { %p2059_p2 = scmp.ne.s32.totalorder %s2057_s7, %s2058_s9  ;;  %s2063_s22 = scalar_lea.hbm %s2879_s0, 512 }
  0x20   : > { %p2064_p0 = scmp.lt.s32.totalorder %s2057_s7, %s2879_s0  ;;  %p2065_p3 = scmp.lt.s32.totalorder %s2063_s22, %s2058_s9 }
  0x21   : > { %p2061_p12 = pnand %p2060_p10, %p2059_p2 }
  0x22   : > { %p2066_p7 = por %p2065_p3, %p2064_p0 }
  0x23   : > { %p2062_p13 = pneg %p2061_p12 }
  0x25   : > { %p2067_p11 = pnand %p2066_p7, %p2062_p13 }
  0x27   : > { %2070 = shalt.err (!%p2067_p11)
}
  0x28   : > { %1813 = dma.hbm_to_vmem [thread:$0]  (!%p2268_p9), %s171_s4, 4096, %s173_s28, %s161_s6, %s2159_s29, %s2159_s29, %s2160_s30  }
  0x29   : > { %184 = sbr.rel (%p2229_p8) target bundleno = 1126 (0x466), region = 32  ;;  %s2288_s20 = sand.u32 (!%p2229_p8), 1, %s2148_s13  }
  0x2a   : > { %s1780_s26 = sshll.u32 (!%p2229_p8), %s2288_s20, 8  ;;  %s187_s27 = scalar_lea.sflag (!%p2229_p8), [#allocation3], %s2288_s20 }
  0x2b   : > { %s2294_s7 = scalar_lea.vmem (!%p2229_p8), [#allocation2], %s1780_s26 }
  0x2e   : > { %2131 = dma.done.wait (%p2216_p4), %s187_s27, 4096  }
  0x2f   : > { %2133 = vsyncadd (%p2216_p4), %s187_s27, 4294963200 }
  0x30   : > { %2135 = dma.done.wait (%p41_p1), [#allocation6], 8256  }
  0x31   : > { %2137 = vsyncadd (%p41_p1), [#allocation6], 4294959040  ;;  %v273_v0 = vld [vmem:[#allocation5 + $0x78] sm:$0xff]  ;;  %v272_v1 = vld [vmem:[#allocation5 + $0x70] sm:$0xff]  ;;  %s2705_s18 = scalar_lea.vmem [#allocation8], %s1780_s26  ;;  %s1790_s23 = sshll.u32 %s2207_s16, 8 }
  0x32   : > { %278 = vmatpush.msra.mxu0 %v273_v0  ;;  %v271_v2 = vld [vmem:[#allocation5 + $0x68] sm:$0xff]  ;;  %v270_v3 = vld [vmem:[#allocation5 + $0x60] sm:$0xff]  ;;  %v269_v4 = vld [vmem:[#allocation5 + $0x58] sm:$0xff]  ;;  %s1675_s28 = scalar_lea.hbm %s2882_s3, %s1790_s23  ;;  %s1676_s16 = sshll.u32 %s2705_s18, 4  ;;  %s1677_s16 = int_to_ptr.vmem [resolvable:$true] %s1676_s16 }
  0x33   : > { %v268_v5 = vld [vmem:[#allocation5 + $0x50] sm:$0xff]  ;;  %v267_v6 = vld [vmem:[#allocation5 + $0x48] sm:$0xff]  ;;  %v266_v7 = vld [vmem:[#allocation5 + $0x40] sm:$0xff]  ;;  %s1678_s4 = sshll.u32 %s1675_s28, 4  ;;  %s1664_s5 = scalar_lea.sflag [#allocation4], %s2288_s20  ;;  %s1679_s4 = int_to_ptr.hbm [resolvable:$true] %s1678_s4 }
  0x34   : > { %279 = vmatpush.msra.mxu0 %v272_v1  ;;  %v265_v8 = vld [vmem:[#allocation5 + $0x38] sm:$0xff]  ;;  %v264_v9 = vld [vmem:[#allocation5 + $0x30] sm:$0xff]  ;;  %v263_v10 = vld [vmem:[#allocation5 + $0x28] sm:$0xff]  ;;  %s2100_s6 = sshra.s32 %s1679_s4, 4  ;;  %s2106_s22 = scalar_lea.hbm %s2882_s3, 512  ;;  %s2101_s6 = int_to_ptr.hbm [resolvable:$true] %s2100_s6 }
  0x35   : > { %v262_v11 = vld [vmem:[#allocation5 + $0x20] sm:$0xff]  ;;  %v261_v12 = vld [vmem:[#allocation5 + $0x18] sm:$0xff]  ;;  %v260_v13 = vld [vmem:[#allocation5 + $0x10] sm:$0xff]  ;;  %s2102_s9 = scalar_lea.hbm %s2101_s6, 256  ;;  %p2107_p11 = scmp.lt.s32.totalorder %s2101_s6, %s2882_s3 }
  0x36   : > { %280 = vmatpush.msra.mxu0 %v271_v2  ;;  %v259_v14 = vld [vmem:[#allocation5 + $0x8] sm:$0xff]  ;;  %v258_v15 = vld [vmem:[#allocation5] sm:$0xff]  ;;  %v228_v18 = vld [vmem:[%s2294_s7 + $0x10] sm:$0xff]  ;;  %p2103_p1 = scmp.ne.s32.totalorder %s2101_s6, %s2102_s9  ;;  %p2108_p9 = scmp.lt.s32.totalorder %s2106_s22, %s2102_s9 }
  0x37   : > { %v226_v16 = vld [vmem:[%s2294_s7] sm:$0xff]  ;;  %v227_v17 = vld [vmem:[%s2294_s7 + $0x8] sm:$0xff]  ;;  %v229_v19 = vld [vmem:[%s2294_s7 + $0x18] sm:$0xff] }
  0x38   : > { %281 = vmatpush.msra.mxu0 %v270_v3  ;;  %v230_v20 = vld [vmem:[%s2294_s7 + $0x20] sm:$0xff]  ;;  %v231_v21 = vld [vmem:[%s2294_s7 + $0x28] sm:$0xff]  ;;  %v232_v22 = vld [vmem:[%s2294_s7 + $0x30] sm:$0xff]  ;;  %p2104_p4 = pnand %p2103_p1, %p2258_p5  ;;  %p2109_p2 = por %p2108_p9, %p2107_p11 }
  0x39   : > { %v233_v23 = vld [vmem:[%s2294_s7 + $0x38] sm:$0xff]  ;;  %v234_v24 = vld [vmem:[%s2294_s7 + $0x40] sm:$0xff]  ;;  %v438_v26 = vld [vmem:[#allocation5 + $0xf0] sm:$0xff] }
  0x3a   : > { %282 = vmatpush.msra.mxu0 %v269_v4  ;;  %v439_v25 = vld [vmem:[#allocation5 + $0xf8] sm:$0xff]  ;;  %v437_v27 = vld [vmem:[#allocation5 + $0xe8] sm:$0xff]  ;;  %v436_v29 = vld [vmem:[#allocation5 + $0xe0] sm:$0xff]  ;;  %p2105_p8 = pneg %p2104_p4 }
  0x3b   : > { %445 = vmatpush.msra.mxu1 %v439_v25  ;;  %v235_v28 = vld [vmem:[%s2294_s7 + $0x48] sm:$0xff]  ;;  %v435_v30 = vld [vmem:[#allocation5 + $0xd8] sm:$0xff]  ;;  %v434_v31 = vld [vmem:[#allocation5 + $0xd0] sm:$0xff] }
  0x3c   : > { %283 = vmatpush.msra.mxu0 %v268_v5  ;;  %v433_v32 = vld [vmem:[#allocation5 + $0xc8] sm:$0xff]  ;;  %v236_v33 = vld [vmem:[%s2294_s7 + $0x50] sm:$0xff]  ;;  %v432_v34 = vld [vmem:[#allocation5 + $0xc0] sm:$0xff]  ;;  %p2110_p10 = pnand %p2109_p2, %p2105_p8 }
  0x3d   : > { %446 = vmatpush.msra.mxu1 %v438_v26  ;;  %v431_v35 = vld [vmem:[#allocation5 + $0xb8] sm:$0xff]  ;;  %v430_v36 = vld [vmem:[#allocation5 + $0xb0] sm:$0xff]  ;;  %v429_v37 = vld [vmem:[#allocation5 + $0xa8] sm:$0xff] }
  0x3e   : > { %284 = vmatpush.msra.mxu0 %v267_v6  ;;  %v237_v38 = vld [vmem:[%s2294_s7 + $0x58] sm:$0xff]  ;;  %v428_v39 = vld [vmem:[#allocation5 + $0xa0] sm:$0xff]  ;;  %v426_v41 = vld [vmem:[#allocation5 + $0x90] sm:$0xff] }
  0x3f   : > { %447 = vmatpush.msra.mxu1 %v437_v27  ;;  %v427_v40 = vld [vmem:[#allocation5 + $0x98] sm:$0xff]  ;;  %v238_v42 = vld [vmem:[%s2294_s7 + $0x60] sm:$0xff]  ;;  %v425_v43 = vld [vmem:[#allocation5 + $0x88] sm:$0xff] }
  0x40   : > { %285 = vmatpush.msra.mxu0 %v266_v7  ;;  %v424_v44 = vld [vmem:[#allocation5 + $0x80] sm:$0xff]  ;;  %v239_v45 = vld [vmem:[%s2294_s7 + $0x68] sm:$0xff]  ;;  %v240_v46 = vld [vmem:[%s2294_s7 + $0x70] sm:$0xff] }
  0x41   : > { %448 = vmatpush.msra.mxu1 %v436_v29  ;;  %v241_v47 = vld [vmem:[%s2294_s7 + $0x78] sm:$0xff]  ;;  %v2320_v48 = vld [vmem:[#allocation7] ss:$0 sm:$0xff]  ;;  %v243_v54 = vld [vmem:[%s2294_s7 + $0x88] sm:$0xff] }
  0x42   : > { %286 = vmatpush.msra.mxu0 %v265_v8  ;;  %v242_v50 = vld [vmem:[%s2294_s7 + $0x80] sm:$0xff]  ;;  %v244_v58 = vld [vmem:[%s2294_s7 + $0x90] sm:$0xff]  ;;  %v245_v62 = vld [vmem:[%s2294_s7 + $0x98] sm:$0xff] }
  0x43   : > { %449 = vmatpush.msra.mxu1 %v435_v30  ;;  %v246_v2 = vld [vmem:[%s2294_s7 + $0xa0] sm:$0xff]  ;;  %v247_v6 = vld [vmem:[%s2294_s7 + $0xa8] sm:$0xff]  ;;  %v605_v25 = vld [vmem:[#allocation5 + $0x170] sm:$0xff] }
  0x44   : > { %287 = vmatpush.msra.mxu0 %v264_v9  ;;  %v604_v27 = vld [vmem:[#allocation5 + $0x168] sm:$0xff]  ;;  %v602_v29 = vld [vmem:[#allocation5 + $0x158] sm:$0xff] }
  0x45   : > { %450 = vmatpush.msra.mxu1 %v434_v31  ;;  %v252_v31 = vld [vmem:[%s2294_s7 + $0xd0] sm:$0xff] }
  0x46   : > { %288 = vmatpush.msra.mxu0 %v263_v10  ;;  %v248_v10 = vld [vmem:[%s2294_s7 + $0xb0] sm:$0xff] }
  0x47   : > { %451 = vmatpush.msra.mxu1 %v433_v32 }
  0x48   : > { %289 = vmatpush.msra.mxu0 %v262_v11 }
  0x49   : > { %452 = vmatpush.msra.mxu1 %v432_v34 }
  0x4a   : > { %290 = vmatpush.msra.mxu0 %v261_v12 }
  0x4b   : > { %453 = vmatpush.msra.mxu1 %v431_v35  ;;  %v600_v35 = vld [vmem:[#allocation5 + $0x148] sm:$0xff] }
  0x4c   : > { %291 = vmatpush.msra.mxu0 %v260_v13 }
  0x4d   : > { %454 = vmatpush.msra.mxu1 %v430_v36  ;;  %v599_v36 = vld [vmem:[#allocation5 + $0x140] sm:$0xff] }
  0x4e   : > { %292 = vmatpush.msra.mxu0 %v259_v14  ;;  %v249_v14 = vld [vmem:[%s2294_s7 + $0xb8] sm:$0xff] }
  0x4f   : > { %455 = vmatpush.msra.mxu1 %v429_v37  ;;  %v598_v37 = vld [vmem:[#allocation5 + $0x138] sm:$0xff] }
  0x50   : > { %293 = vmatpush.msra.mxu0 %v258_v15 }
  0x51   : > { %294 = vmatmul.f32.vlgmr.msra.gmra.mxu0 %v226_v16  ;;  %456 = vmatpush.msra.mxu1 %v428_v39  ;;  %v253_v39 = vld [vmem:[%s2294_s7 + $0xd8] sm:$0xff] }
  0x53   : > { %457 = vmatpush.msra.mxu1 %v427_v40 }
  0x55   : > { %458 = vmatpush.msra.mxu1 %v426_v41  ;;  %v597_v41 = vld [vmem:[#allocation5 + $0x130] sm:$0xff] }
  0x57   : > { %459 = vmatpush.msra.mxu1 %v425_v43  ;;  %v596_v43 = vld [vmem:[#allocation5 + $0x128] sm:$0xff] }
  0x59   : > { %297 = vmatmul.f32.gmra.mxu0 %v227_v17  ;;  %460 = vmatpush.msra.mxu1 %v424_v44  ;;  %v595_v44 = vld [vmem:[#allocation5 + $0x120] sm:$0xff] }
  0x61   : > { %300 = vmatmul.f32.gmra.mxu0 %v228_v18  ;;  %v250_v18 = vld [vmem:[%s2294_s7 + $0xc0] sm:$0xff] }
  0x69   : > { %303 = vmatmul.f32.gmra.mxu0 %v229_v19 }
  0x71   : > { %306 = vmatmul.f32.gmra.mxu0 %v230_v20 }
  0x79   : > { %309 = vmatmul.f32.gmra.mxu0 %v231_v21  ;;  %v606_v21 = vld [vmem:[#allocation5 + $0x178] sm:$0xff] }
  0x7a   : > { %612 = vmatpush.msra.mxu2 %v606_v21 }
  0x7c   : > { %613 = vmatpush.msra.mxu2 %v605_v25 }
  0x7e   : > { %614 = vmatpush.msra.mxu2 %v604_v27 }
  0x81   : > { %312 = vmatmul.f32.gmra.mxu0 %v232_v22 }
  0x89   : > { %315 = vmatmul.f32.gmra.mxu0 %v233_v23  ;;  %v251_v23 = vld [vmem:[%s2294_s7 + $0xc8] sm:$0xff] }
  0x91   : > { %318 = vmatmul.f32.gmra.mxu0 %v234_v24 }
  0x99   : > { %321 = vmatmul.f32.gmra.mxu0 %v235_v28  ;;  %v603_v28 = vld [vmem:[#allocation5 + $0x160] sm:$0xff] }
  0x9a   : > { %615 = vmatpush.msra.mxu2 %v603_v28 }
  0x9c   : > { %616 = vmatpush.msra.mxu2 %v602_v29 }
  0xa1   : > { %324 = vmatmul.f32.gmra.mxu0 %v236_v33  ;;  %v601_v33 = vld [vmem:[#allocation5 + $0x150] sm:$0xff] }
  0xa2   : > { %617 = vmatpush.msra.mxu2 %v601_v33 }
  0xa4   : > { %618 = vmatpush.msra.mxu2 %v600_v35 }
  0xa6   : > { %619 = vmatpush.msra.mxu2 %v599_v36 }
  0xa8   : > { %620 = vmatpush.msra.mxu2 %v598_v37 }
  0xa9   : > { %327 = vmatmul.f32.gmra.mxu0 %v237_v38 }
  0xaa   : > { %621 = vmatpush.msra.mxu2 %v597_v41 }
  0xac   : > { %622 = vmatpush.msra.mxu2 %v596_v43 }
  0xae   : > { %623 = vmatpush.msra.mxu2 %v595_v44 }
  0xb1   : > { %330 = vmatmul.f32.gmra.mxu0 %v238_v42 }
  0xb9   : > { %333 = vmatmul.f32.gmra.mxu0 %v239_v45  ;;  %v594_v45 = vld [vmem:[#allocation5 + $0x118] sm:$0xff] }
  0xba   : > { %624 = vmatpush.msra.mxu2 %v594_v45 }
  0xc1   : > { %336 = vmatmul.f32.gmra.mxu0 %v240_v46 }
  0xc9   : > { %339 = vmatmul.f32.gmra.mxu0 %v241_v47  ;;  %v254_v47 = vld [vmem:[%s2294_s7 + $0xe0] sm:$0xff] }
  0xce   : > { %v295_v49 = vpop.f32.mrf.mxu0 }
  0xcf   : > { %v296_v51 = vadd.f32 %v2320_v48, %v295_v49 }
  0xd1   : > { %342 = vmatmul.f32.gmra.mxu0 %v242_v50  ;;  %v391_v52 = vmax.f32 %v296_v51, 0.0  ;;  %v593_v50 = vld [vmem:[#allocation5 + $0x110] sm:$0xff] }
  0xd2   : > { %625 = vmatpush.msra.mxu2 %v593_v50 }
  0xd3   : > { %461 = vmatmul.f32.vlgmr.msra.gmra.mxu1 %v391_v52  ;;  %v592_v52 = vld [vmem:[#allocation5 + $0x108] sm:$0xff] }
  0xd4   : > { %626 = vmatpush.msra.mxu2 %v592_v52 }
  0xd6   : > { %v298_v53 = vpop.f32.mrf.mxu0 }
  0xd7   : > { %v299_v55 = vadd.f32 %v2320_v48, %v298_v53  ;;  %v591_v53 = vld [vmem:[#allocation5 + $0x100] sm:$0xff] }
  0xd8   : > { %627 = vmatpush.msra.mxu2 %v591_v53 }
  0xd9   : > { %345 = vmatmul.f32.gmra.mxu0 %v243_v54  ;;  %v392_v56 = vmax.f32 %v299_v55, 0.0  ;;  %v255_v55 = vld [vmem:[%s2294_s7 + $0xe8] sm:$0xff] }
  0xdb   : > { %464 = vmatmul.f32.gmra.mxu1 %v392_v56 }
  0xde   : > { %v301_v57 = vpop.f32.mrf.mxu0 }
  0xdf   : > { %v302_v59 = vadd.f32 %v2320_v48, %v301_v57 }
  0xe1   : > { %348 = vmatmul.f32.gmra.mxu0 %v244_v58  ;;  %v393_v60 = vmax.f32 %v302_v59, 0.0  ;;  %v256_v59 = vld [vmem:[%s2294_s7 + $0xf0] sm:$0xff] }
  0xe3   : > { %467 = vmatmul.f32.gmra.mxu1 %v393_v60 }
  0xe6   : > { %v304_v61 = vpop.f32.mrf.mxu0 }
  0xe7   : > { %v305_v63 = vadd.f32 %v2320_v48, %v304_v61 }
  0xe9   : > { %351 = vmatmul.f32.gmra.mxu0 %v245_v62  ;;  %v394_v0 = vmax.f32 %v305_v63, 0.0  ;;  %v257_v63 = vld [vmem:[%s2294_s7 + $0xf8] sm:$0xff] }
  0xeb   : > { %470 = vmatmul.f32.gmra.mxu1 %v394_v0 }
  0xee   : > { %v307_v1 = vpop.f32.mrf.mxu0 }
  0xef   : > { %v308_v3 = vadd.f32 %v2320_v48, %v307_v1 }
  0xf1   : > { %354 = vmatmul.f32.gmra.mxu0 %v246_v2  ;;  %v395_v4 = vmax.f32 %v308_v3, 0.0  ;;  %v2354_v2 = vld [vmem:[#allocation7 + $0x1] ss:$0 sm:$0xff] }
  0xf3   : > { %473 = vmatmul.f32.gmra.mxu1 %v395_v4 }
  0xf6   : > { %v310_v5 = vpop.f32.mrf.mxu0 }
  0xf7   : > { %v311_v7 = vadd.f32 %v2320_v48, %v310_v5 }
  0xf9   : > { %357 = vmatmul.f32.gmra.mxu0 %v247_v6  ;;  %v396_v8 = vmax.f32 %v311_v7, 0.0 }
  0xfb   : > { %476 = vmatmul.f32.gmra.mxu1 %v396_v8 }
  0xfe   : > { %v313_v9 = vpop.f32.mrf.mxu0 }
  0xff   : > { %v314_v11 = vadd.f32 %v2320_v48, %v313_v9 }
 0x101   : > { %360 = vmatmul.f32.gmra.mxu0 %v248_v10  ;;  %v397_v12 = vmax.f32 %v314_v11, 0.0 }
 0x103   : > { %479 = vmatmul.f32.gmra.mxu1 %v397_v12 }
 0x106   : > { %v316_v13 = vpop.f32.mrf.mxu0 }
 0x107   : > { %v317_v15 = vadd.f32 %v2320_v48, %v316_v13 }
 0x109   : > { %363 = vmatmul.f32.gmra.mxu0 %v249_v14  ;;  %v398_v16 = vmax.f32 %v317_v15, 0.0 }
 0x10b   : > { %482 = vmatmul.f32.gmra.mxu1 %v398_v16 }
 0x10e   : > { %v319_v17 = vpop.f32.mrf.mxu0 }
 0x10f   : > { %v320_v19 = vadd.f32 %v2320_v48, %v319_v17 }
 0x111   : > { %v399_v20 = vmax.f32 %v320_v19, 0.0  ;;  %366 = vmatmul.f32.gmra.mxu0 %v250_v18 }
 0x113   : > { %485 = vmatmul.f32.gmra.mxu1 %v399_v20 }
 0x116   : > { %v322_v22 = vpop.f32.mrf.mxu0 }
 0x117   : > { %v323_v24 = vadd.f32 %v2320_v48, %v322_v22 }
 0x119   : > { %v400_v26 = vmax.f32 %v323_v24, 0.0  ;;  %369 = vmatmul.f32.gmra.mxu0 %v251_v23 }
 0x11b   : > { %488 = vmatmul.f32.gmra.mxu1 %v400_v26 }
 0x11e   : > { %v325_v30 = vpop.f32.mrf.mxu0 }
 0x11f   : > { %v326_v32 = vadd.f32 %v2320_v48, %v325_v30 }
 0x121   : > { %v401_v34 = vmax.f32 %v326_v32, 0.0  ;;  %372 = vmatmul.f32.gmra.mxu0 %v252_v31 }
 0x123   : > { %491 = vmatmul.f32.gmra.mxu1 %v401_v34 }
 0x126   : > { %v328_v38 = vpop.f32.mrf.mxu0 }
 0x127   : > { %v329_v40 = vadd.f32 %v2320_v48, %v328_v38 }
 0x129   : > { %v402_v42 = vmax.f32 %v329_v40, 0.0  ;;  %375 = vmatmul.f32.gmra.mxu0 %v253_v39 }
 0x12b   : > { %494 = vmatmul.f32.gmra.mxu1 %v402_v42 }
 0x12e   : > { %v331_v46 = vpop.f32.mrf.mxu0 }
 0x12f   : > { %v332_v49 = vadd.f32 %v2320_v48, %v331_v46 }
 0x131   : > { %v403_v51 = vmax.f32 %v332_v49, 0.0  ;;  %378 = vmatmul.f32.gmra.mxu0 %v254_v47 }
 0x133   : > { %497 = vmatmul.f32.gmra.mxu1 %v403_v51 }
 0x136   : > { %v334_v54 = vpop.f32.mrf.mxu0 }
 0x137   : > { %v335_v56 = vadd.f32 %v2320_v48, %v334_v54 }
 0x139   : > { %v404_v57 = vmax.f32 %v335_v56, 0.0  ;;  %381 = vmatmul.f32.gmra.mxu0 %v255_v55 }
 0x13b   : > { %500 = vmatmul.f32.gmra.mxu1 %v404_v57 }
 0x13e   : > { %v337_v58 = vpop.f32.mrf.mxu0 }
 0x13f   : > { %v338_v60 = vadd.f32 %v2320_v48, %v337_v58 }
 0x141   : > { %v405_v61 = vmax.f32 %v338_v60, 0.0  ;;  %384 = vmatmul.f32.gmra.mxu0 %v256_v59 }
 0x143   : > { %503 = vmatmul.f32.gmra.mxu1 %v405_v61 }
 0x146   : > { %v340_v62 = vpop.f32.mrf.mxu0 }
 0x147   : > { %v341_v0 = vadd.f32 %v2320_v48, %v340_v62 }
 0x149   : > { %v406_v1 = vmax.f32 %v341_v0, 0.0  ;;  %387 = vmatmul.f32.gmra.mxu0 %v257_v63  ;;  %v773_v0 = vld [vmem:[#allocation5 + $0x1f8] sm:$0xff] }
 0x14a   : > { %779 = vmatpush.msra.mxu3 %v773_v0 }
 0x14b   : > { %506 = vmatmul.f32.gmra.mxu1 %v406_v1 }
 0x14e   : > { %v343_v3 = vpop.f32.mrf.mxu0 }
 0x14f   : > { %v344_v4 = vadd.f32 %v2320_v48, %v343_v3 }
 0x150   : > { %v462_v5 = vpop.f32.mrf.mxu1 }
 0x151   : > { %v407_v6 = vmax.f32 %v344_v4, 0.0  ;;  %v463_v7 = vadd.f32 %v2354_v2, %v462_v5  ;;  %v772_v4 = vld [vmem:[#allocation5 + $0x1f0] sm:$0xff] }
 0x152   : > { %780 = vmatpush.msra.mxu3 %v772_v4 }
 0x153   : > { %509 = vmatmul.f32.gmra.mxu1 %v407_v6  ;;  %v558_v8 = vmax.f32 %v463_v7, 0.0 }
 0x155   : > { %628 = vmatmul.f32.vlgmr.msra.gmra.mxu2 %v558_v8  ;;  %v771_v8 = vld [vmem:[#allocation5 + $0x1e8] sm:$0xff] }
 0x156   : > { %v346_v9 = vpop.f32.mrf.mxu0  ;;  %781 = vmatpush.msra.mxu3 %v771_v8 }
 0x157   : > { %v347_v10 = vadd.f32 %v2320_v48, %v346_v9 }
 0x158   : > { %v465_v11 = vpop.f32.mrf.mxu1 }
 0x159   : > { %v408_v12 = vmax.f32 %v347_v10, 0.0  ;;  %v466_v13 = vadd.f32 %v2354_v2, %v465_v11  ;;  %v770_v10 = vld [vmem:[#allocation5 + $0x1e0] sm:$0xff]  ;;  %v769_v11 = vld [vmem:[#allocation5 + $0x1d8] sm:$0xff] }
 0x15a   : > { %782 = vmatpush.msra.mxu3 %v770_v10 }
 0x15b   : > { %512 = vmatmul.f32.gmra.mxu1 %v408_v12  ;;  %v559_v14 = vmax.f32 %v466_v13, 0.0 }
 0x15c   : > { %783 = vmatpush.msra.mxu3 %v769_v11 }
 0x15d   : > { %631 = vmatmul.f32.gmra.mxu2 %v559_v14  ;;  %v768_v14 = vld [vmem:[#allocation5 + $0x1d0] sm:$0xff] }
 0x15e   : > { %v349_v15 = vpop.f32.mrf.mxu0  ;;  %784 = vmatpush.msra.mxu3 %v768_v14 }
 0x15f   : > { %v350_v16 = vadd.f32 %v2320_v48, %v349_v15 }
 0x160   : > { %v468_v17 = vpop.f32.mrf.mxu1 }
 0x161   : > { %v409_v18 = vmax.f32 %v350_v16, 0.0  ;;  %v469_v19 = vadd.f32 %v2354_v2, %v468_v17 }
 0x163   : > { %515 = vmatmul.f32.gmra.mxu1 %v409_v18  ;;  %v560_v20 = vmax.f32 %v469_v19, 0.0  ;;  %v767_v18 = vld [vmem:[#allocation5 + $0x1c8] sm:$0xff] }
 0x164   : > { %785 = vmatpush.msra.mxu3 %v767_v18 }
 0x165   : > { %634 = vmatmul.f32.gmra.mxu2 %v560_v20  ;;  %v766_v20 = vld [vmem:[#allocation5 + $0x1c0] sm:$0xff] }
 0x166   : > { %v352_v21 = vpop.f32.mrf.mxu0  ;;  %786 = vmatpush.msra.mxu3 %v766_v20 }
 0x167   : > { %v353_v22 = vadd.f32 %v2320_v48, %v352_v21  ;;  %v765_v21 = vld [vmem:[#allocation5 + $0x1b8] sm:$0xff] }
 0x168   : > { %v471_v23 = vpop.f32.mrf.mxu1  ;;  %787 = vmatpush.msra.mxu3 %v765_v21 }
 0x169   : > { %v410_v24 = vmax.f32 %v353_v22, 0.0  ;;  %v472_v25 = vadd.f32 %v2354_v2, %v471_v23 }
 0x16b   : > { %518 = vmatmul.f32.gmra.mxu1 %v410_v24  ;;  %v561_v26 = vmax.f32 %v472_v25, 0.0  ;;  %v764_v24 = vld [vmem:[#allocation5 + $0x1b0] sm:$0xff] }
 0x16c   : > { %788 = vmatpush.msra.mxu3 %v764_v24 }
 0x16d   : > { %637 = vmatmul.f32.gmra.mxu2 %v561_v26 }
 0x16e   : > { %v355_v27 = vpop.f32.mrf.mxu0 }
 0x16f   : > { %v356_v28 = vadd.f32 %v2320_v48, %v355_v27 }
 0x170   : > { %v474_v29 = vpop.f32.mrf.mxu1 }
 0x171   : > { %v411_v30 = vmax.f32 %v356_v28, 0.0  ;;  %v475_v31 = vadd.f32 %v2354_v2, %v474_v29  ;;  %v763_v28 = vld [vmem:[#allocation5 + $0x1a8] sm:$0xff] }
 0x172   : > { %789 = vmatpush.msra.mxu3 %v763_v28 }
 0x173   : > { %521 = vmatmul.f32.gmra.mxu1 %v411_v30  ;;  %v562_v32 = vmax.f32 %v475_v31, 0.0  ;;  %v762_v30 = vld [vmem:[#allocation5 + $0x1a0] sm:$0xff]  ;;  %v761_v31 = vld [vmem:[#allocation5 + $0x198] sm:$0xff] }
 0x174   : > { %790 = vmatpush.msra.mxu3 %v762_v30 }
 0x175   : > { %640 = vmatmul.f32.gmra.mxu2 %v562_v32 }
 0x176   : > { %v358_v33 = vpop.f32.mrf.mxu0  ;;  %791 = vmatpush.msra.mxu3 %v761_v31 }
 0x177   : > { %v359_v34 = vadd.f32 %v2320_v48, %v358_v33 }
 0x178   : > { %v477_v35 = vpop.f32.mrf.mxu1 }
 0x179   : > { %v412_v36 = vmax.f32 %v359_v34, 0.0  ;;  %v478_v37 = vadd.f32 %v2354_v2, %v477_v35  ;;  %v760_v34 = vld [vmem:[#allocation5 + $0x190] sm:$0xff] }
 0x17a   : > { %792 = vmatpush.msra.mxu3 %v760_v34 }
 0x17b   : > { %524 = vmatmul.f32.gmra.mxu1 %v412_v36  ;;  %v563_v38 = vmax.f32 %v478_v37, 0.0 }
 0x17d   : > { %643 = vmatmul.f32.gmra.mxu2 %v563_v38  ;;  %v759_v38 = vld [vmem:[#allocation5 + $0x188] sm:$0xff] }
 0x17e   : > { %v361_v39 = vpop.f32.mrf.mxu0  ;;  %793 = vmatpush.msra.mxu3 %v759_v38 }
 0x17f   : > { %v362_v40 = vadd.f32 %v2320_v48, %v361_v39 }
 0x180   : > { %v480_v41 = vpop.f32.mrf.mxu1 }
 0x181   : > { %v413_v42 = vmax.f32 %v362_v40, 0.0  ;;  %v481_v43 = vadd.f32 %v2354_v2, %v480_v41  ;;  %v758_v40 = vld [vmem:[#allocation5 + $0x180] sm:$0xff] }
 0x182   : > { %794 = vmatpush.msra.mxu3 %v758_v40 }
 0x183   : > { %527 = vmatmul.f32.gmra.mxu1 %v413_v42  ;;  %v564_v44 = vmax.f32 %v481_v43, 0.0 }
 0x185   : > { %646 = vmatmul.f32.gmra.mxu2 %v564_v44 }
 0x186   : > { %v364_v45 = vpop.f32.mrf.mxu0 }
 0x187   : > { %v365_v46 = vadd.f32 %v2320_v48, %v364_v45 }
 0x188   : > { %v483_v47 = vpop.f32.mrf.mxu1 }
 0x189   : > { %v414_v49 = vmax.f32 %v365_v46, 0.0  ;;  %v484_v50 = vadd.f32 %v2354_v2, %v483_v47 }
 0x18b   : > { %530 = vmatmul.f32.gmra.mxu1 %v414_v49  ;;  %v565_v51 = vmax.f32 %v484_v50, 0.0 }
 0x18d   : > { %649 = vmatmul.f32.gmra.mxu2 %v565_v51 }
 0x18e   : > { %v367_v52 = vpop.f32.mrf.mxu0 }
 0x18f   : > { %v368_v53 = vadd.f32 %v2320_v48, %v367_v52 }
 0x190   : > { %v486_v54 = vpop.f32.mrf.mxu1 }
 0x191   : > { %v415_v55 = vmax.f32 %v368_v53, 0.0  ;;  %v487_v56 = vadd.f32 %v2354_v2, %v486_v54 }
 0x193   : > { %v566_v57 = vmax.f32 %v487_v56, 0.0  ;;  %533 = vmatmul.f32.gmra.mxu1 %v415_v55 }
 0x195   : > { %652 = vmatmul.f32.gmra.mxu2 %v566_v57  ;;  %v2389_v57 = vld [vmem:[#allocation7 + $0x2] ss:$0 sm:$0xff] }
 0x196   : > { %v370_v58 = vpop.f32.mrf.mxu0 }
 0x197   : > { %v371_v59 = vadd.f32 %v2320_v48, %v370_v58 }
 0x198   : > { %v489_v60 = vpop.f32.mrf.mxu1 }
 0x199   : > { %v416_v61 = vmax.f32 %v371_v59, 0.0  ;;  %v490_v62 = vadd.f32 %v2354_v2, %v489_v60 }
 0x19b   : > { %v567_v63 = vmax.f32 %v490_v62, 0.0  ;;  %536 = vmatmul.f32.gmra.mxu1 %v416_v61 }
 0x19d   : > { %655 = vmatmul.f32.gmra.mxu2 %v567_v63 }
 0x19e   : > { %v373_v1 = vpop.f32.mrf.mxu0 }
 0x19f   : > { %v374_v3 = vadd.f32 %v2320_v48, %v373_v1 }
 0x1a0   : > { %v492_v5 = vpop.f32.mrf.mxu1 }
 0x1a1   : > { %v417_v6 = vmax.f32 %v374_v3, 0.0  ;;  %v493_v7 = vadd.f32 %v2354_v2, %v492_v5 }
 0x1a3   : > { %v568_v9 = vmax.f32 %v493_v7, 0.0  ;;  %539 = vmatmul.f32.gmra.mxu1 %v417_v6 }
 0x1a5   : > { %658 = vmatmul.f32.gmra.mxu2 %v568_v9 }
 0x1a6   : > { %v376_v12 = vpop.f32.mrf.mxu0 }
 0x1a7   : > { %v377_v13 = vadd.f32 %v2320_v48, %v376_v12 }
 0x1a8   : > { %v495_v15 = vpop.f32.mrf.mxu1 }
 0x1a9   : > { %v418_v16 = vmax.f32 %v377_v13, 0.0  ;;  %v496_v17 = vadd.f32 %v2354_v2, %v495_v15 }
 0x1ab   : > { %v569_v19 = vmax.f32 %v496_v17, 0.0  ;;  %542 = vmatmul.f32.gmra.mxu1 %v418_v16 }
 0x1ad   : > { %661 = vmatmul.f32.gmra.mxu2 %v569_v19 }
 0x1ae   : > { %v379_v22 = vpop.f32.mrf.mxu0 }
 0x1af   : > { %v380_v23 = vadd.f32 %v2320_v48, %v379_v22 }
 0x1b0   : > { %v498_v25 = vpop.f32.mrf.mxu1 }
 0x1b1   : > { %v419_v26 = vmax.f32 %v380_v23, 0.0  ;;  %v499_v27 = vadd.f32 %v2354_v2, %v498_v25 }
 0x1b3   : > { %v570_v29 = vmax.f32 %v499_v27, 0.0  ;;  %545 = vmatmul.f32.gmra.mxu1 %v419_v26 }
 0x1b5   : > { %664 = vmatmul.f32.gmra.mxu2 %v570_v29 }
 0x1b6   : > { %v382_v32 = vpop.f32.mrf.mxu0 }
 0x1b7   : > { %v383_v33 = vadd.f32 %v2320_v48, %v382_v32 }
 0x1b8   : > { %v501_v35 = vpop.f32.mrf.mxu1 }
 0x1b9   : > { %v420_v36 = vmax.f32 %v383_v33, 0.0  ;;  %v502_v37 = vadd.f32 %v2354_v2, %v501_v35 }
 0x1bb   : > { %v571_v39 = vmax.f32 %v502_v37, 0.0  ;;  %548 = vmatmul.f32.gmra.mxu1 %v420_v36 }
 0x1bd   : > { %667 = vmatmul.f32.gmra.mxu2 %v571_v39 }
 0x1be   : > { %v385_v41 = vpop.f32.mrf.mxu0 }
 0x1bf   : > { %v386_v42 = vadd.f32 %v2320_v48, %v385_v41 }
 0x1c0   : > { %v504_v43 = vpop.f32.mrf.mxu1 }
 0x1c1   : > { %v421_v44 = vmax.f32 %v386_v42, 0.0  ;;  %v505_v45 = vadd.f32 %v2354_v2, %v504_v43 }
 0x1c3   : > { %v572_v46 = vmax.f32 %v505_v45, 0.0  ;;  %551 = vmatmul.f32.gmra.mxu1 %v421_v44 }
 0x1c5   : > { %670 = vmatmul.f32.gmra.mxu2 %v572_v46 }
 0x1c6   : > { %v388_v47 = vpop.f32.mrf.mxu0 }
 0x1c7   : > { %v389_v49 = vadd.f32 %v2320_v48, %v388_v47 }
 0x1c8   : > { %v507_v50 = vpop.f32.mrf.mxu1 }
 0x1c9   : > { %v422_v51 = vmax.f32 %v389_v49, 0.0  ;;  %v508_v52 = vadd.f32 %v2354_v2, %v507_v50 }
 0x1cb   : > { %v573_v53 = vmax.f32 %v508_v52, 0.0  ;;  %554 = vmatmul.f32.gmra.mxu1 %v422_v51 }
 0x1cd   : > { %673 = vmatmul.f32.gmra.mxu2 %v573_v53 }
 0x1d0   : > { %v510_v54 = vpop.f32.mrf.mxu1 }
 0x1d1   : > { %v511_v55 = vadd.f32 %v2354_v2, %v510_v54 }
 0x1d3   : > { %v574_v56 = vmax.f32 %v511_v55, 0.0 }
 0x1d5   : > { %676 = vmatmul.f32.gmra.mxu2 %v574_v56 }
 0x1d8   : > { %v513_v58 = vpop.f32.mrf.mxu1  ;;  %v629_v59 = vpop.f32.mrf.mxu2 }
 0x1d9   : > { %v514_v60 = vadd.f32 %v2354_v2, %v513_v58  ;;  %v630_v48 = vadd.f32 %v2389_v57, %v629_v59 }
 0x1db   : > { %v575_v61 = vmax.f32 %v514_v60, 0.0  ;;  %v725_v62 = vmax.f32 %v630_v48, 0.0 }
 0x1dd   : > { %679 = vmatmul.f32.gmra.mxu2 %v575_v61  ;;  %795 = vmatmul.f32.vlgmr.msra.gmra.mxu3 %v725_v62 }
 0x1e0   : > { %v516_v63 = vpop.f32.mrf.mxu1  ;;  %v632_v0 = vpop.f32.mrf.mxu2 }
 0x1e1   : > { %v517_v1 = vadd.f32 %v2354_v2, %v516_v63  ;;  %v633_v3 = vadd.f32 %v2389_v57, %v632_v0 }
 0x1e3   : > { %v576_v4 = vmax.f32 %v517_v1, 0.0  ;;  %v726_v5 = vmax.f32 %v633_v3, 0.0 }
 0x1e5   : > { %682 = vmatmul.f32.gmra.mxu2 %v576_v4  ;;  %798 = vmatmul.f32.gmra.mxu3 %v726_v5 }
 0x1e8   : > { %v519_v6 = vpop.f32.mrf.mxu1  ;;  %v635_v7 = vpop.f32.mrf.mxu2 }
 0x1e9   : > { %v520_v8 = vadd.f32 %v2354_v2, %v519_v6  ;;  %v636_v9 = vadd.f32 %v2389_v57, %v635_v7 }
 0x1eb   : > { %v577_v10 = vmax.f32 %v520_v8, 0.0  ;;  %v727_v11 = vmax.f32 %v636_v9, 0.0 }
 0x1ed   : > { %685 = vmatmul.f32.gmra.mxu2 %v577_v10  ;;  %801 = vmatmul.f32.gmra.mxu3 %v727_v11 }
 0x1f0   : > { %v522_v12 = vpop.f32.mrf.mxu1  ;;  %v638_v13 = vpop.f32.mrf.mxu2 }
 0x1f1   : > { %v523_v14 = vadd.f32 %v2354_v2, %v522_v12  ;;  %v639_v15 = vadd.f32 %v2389_v57, %v638_v13 }
 0x1f3   : > { %v578_v16 = vmax.f32 %v523_v14, 0.0  ;;  %v728_v17 = vmax.f32 %v639_v15, 0.0 }
 0x1f5   : > { %688 = vmatmul.f32.gmra.mxu2 %v578_v16  ;;  %804 = vmatmul.f32.gmra.mxu3 %v728_v17 }
 0x1f8   : > { %v525_v18 = vpop.f32.mrf.mxu1  ;;  %v641_v19 = vpop.f32.mrf.mxu2 }
 0x1f9   : > { %v526_v20 = vadd.f32 %v2354_v2, %v525_v18  ;;  %v642_v21 = vadd.f32 %v2389_v57, %v641_v19 }
 0x1fb   : > { %v579_v22 = vmax.f32 %v526_v20, 0.0  ;;  %v729_v23 = vmax.f32 %v642_v21, 0.0 }
 0x1fd   : > { %691 = vmatmul.f32.gmra.mxu2 %v579_v22  ;;  %807 = vmatmul.f32.gmra.mxu3 %v729_v23 }
 0x200   : > { %v528_v24 = vpop.f32.mrf.mxu1  ;;  %v644_v25 = vpop.f32.mrf.mxu2 }
 0x201   : > { %v529_v26 = vadd.f32 %v2354_v2, %v528_v24  ;;  %v645_v27 = vadd.f32 %v2389_v57, %v644_v25 }
 0x203   : > { %v580_v28 = vmax.f32 %v529_v26, 0.0  ;;  %v730_v29 = vmax.f32 %v645_v27, 0.0  ;;  %v892_v26 = vlaneseq }
 0x205   : > { %694 = vmatmul.f32.gmra.mxu2 %v580_v28  ;;  %810 = vmatmul.f32.gmra.mxu3 %v730_v29  ;;  %v2423_v29 = vand.u32 127, %v892_v26 }
 0x207   : > { %vm894_vm0 = vcmp.lt.s32.totalorder %v2423_v29, 10 }
 0x208   : > { %v531_v30 = vpop.f32.mrf.mxu1  ;;  %v647_v31 = vpop.f32.mrf.mxu2 }
 0x209   : > { %v532_v32 = vadd.f32 %v2354_v2, %v531_v30  ;;  %v648_v33 = vadd.f32 %v2389_v57, %v647_v31 }
 0x20b   : > { %v581_v34 = vmax.f32 %v532_v32, 0.0  ;;  %v731_v35 = vmax.f32 %v648_v33, 0.0 }
 0x20d   : > { %697 = vmatmul.f32.gmra.mxu2 %v581_v34  ;;  %813 = vmatmul.f32.gmra.mxu3 %v731_v35 }
 0x210   : > { %v534_v36 = vpop.f32.mrf.mxu1  ;;  %v650_v37 = vpop.f32.mrf.mxu2 }
 0x211   : > { %v535_v38 = vadd.f32 %v2354_v2, %v534_v36  ;;  %v651_v39 = vadd.f32 %v2389_v57, %v650_v37 }
 0x213   : > { %v582_v40 = vmax.f32 %v535_v38, 0.0  ;;  %v732_v41 = vmax.f32 %v651_v39, 0.0 }
 0x215   : > { %700 = vmatmul.f32.gmra.mxu2 %v582_v40  ;;  %816 = vmatmul.f32.gmra.mxu3 %v732_v41 }
 0x218   : > { %v537_v42 = vpop.f32.mrf.mxu1  ;;  %v653_v43 = vpop.f32.mrf.mxu2 }
 0x219   : > { %v538_v44 = vadd.f32 %v2354_v2, %v537_v42  ;;  %v654_v45 = vadd.f32 %v2389_v57, %v653_v43 }
 0x21b   : > { %v583_v46 = vmax.f32 %v538_v44, 0.0  ;;  %v733_v47 = vmax.f32 %v654_v45, 0.0 }
 0x21d   : > { %703 = vmatmul.f32.gmra.mxu2 %v583_v46  ;;  %819 = vmatmul.f32.gmra.mxu3 %v733_v47 }
 0x220   : > { %v540_v49 = vpop.f32.mrf.mxu1  ;;  %v656_v50 = vpop.f32.mrf.mxu2 }
 0x221   : > { %v541_v51 = vadd.f32 %v2354_v2, %v540_v49  ;;  %v657_v52 = vadd.f32 %v2389_v57, %v656_v50 }
 0x223   : > { %v584_v53 = vmax.f32 %v541_v51, 0.0  ;;  %v734_v54 = vmax.f32 %v657_v52, 0.0 }
 0x225   : > { %706 = vmatmul.f32.gmra.mxu2 %v584_v53  ;;  %822 = vmatmul.f32.gmra.mxu3 %v734_v54 }
 0x228   : > { %v543_v55 = vpop.f32.mrf.mxu1  ;;  %v659_v56 = vpop.f32.mrf.mxu2 }
 0x229   : > { %v544_v58 = vadd.f32 %v2354_v2, %v543_v55  ;;  %v660_v59 = vadd.f32 %v2389_v57, %v659_v56 }
 0x22b   : > { %v585_v60 = vmax.f32 %v544_v58, 0.0  ;;  %v735_v48 = vmax.f32 %v660_v59, 0.0 }
 0x22d   : > { %709 = vmatmul.f32.gmra.mxu2 %v585_v60  ;;  %825 = vmatmul.f32.gmra.mxu3 %v735_v48 }
 0x230   : > { %v546_v61 = vpop.f32.mrf.mxu1  ;;  %v662_v62 = vpop.f32.mrf.mxu2 }
 0x231   : > { %v547_v63 = vadd.f32 %v2354_v2, %v546_v61  ;;  %v663_v0 = vadd.f32 %v2389_v57, %v662_v62 }
 0x233   : > { %v586_v1 = vmax.f32 %v547_v63, 0.0  ;;  %v736_v3 = vmax.f32 %v663_v0, 0.0 }
 0x235   : > { %712 = vmatmul.f32.gmra.mxu2 %v586_v1  ;;  %828 = vmatmul.f32.gmra.mxu3 %v736_v3 }
 0x238   : > { %v549_v4 = vpop.f32.mrf.mxu1  ;;  %v665_v5 = vpop.f32.mrf.mxu2 }
 0x239   : > { %v550_v6 = vadd.f32 %v2354_v2, %v549_v4  ;;  %v666_v7 = vadd.f32 %v2389_v57, %v665_v5 }
 0x23b   : > { %v587_v8 = vmax.f32 %v550_v6, 0.0  ;;  %v737_v9 = vmax.f32 %v666_v7, 0.0 }
 0x23d   : > { %715 = vmatmul.f32.gmra.mxu2 %v587_v8  ;;  %831 = vmatmul.f32.gmra.mxu3 %v737_v9 }
 0x240   : > { %v552_v10 = vpop.f32.mrf.mxu1  ;;  %v668_v11 = vpop.f32.mrf.mxu2 }
 0x241   : > { %v553_v12 = vadd.f32 %v2354_v2, %v552_v10  ;;  %v669_v13 = vadd.f32 %v2389_v57, %v668_v11 }
 0x243   : > { %v588_v14 = vmax.f32 %v553_v12, 0.0  ;;  %v738_v15 = vmax.f32 %v669_v13, 0.0 }
 0x245   : > { %718 = vmatmul.f32.gmra.mxu2 %v588_v14  ;;  %834 = vmatmul.f32.gmra.mxu3 %v738_v15 }
 0x248   : > { %v555_v16 = vpop.f32.mrf.mxu1  ;;  %v671_v17 = vpop.f32.mrf.mxu2 }
 0x249   : > { %v556_v18 = vadd.f32 %v2354_v2, %v555_v16  ;;  %v672_v19 = vadd.f32 %v2389_v57, %v671_v17  ;;  %v2425_v2 = vld [vmem:[#allocation7 + $0x3] ss:$0 sm:$0xff] }
 0x24b   : > { %v589_v20 = vmax.f32 %v556_v18, 0.0  ;;  %v739_v21 = vmax.f32 %v672_v19, 0.0 }
 0x24d   : > { %721 = vmatmul.f32.gmra.mxu2 %v589_v20  ;;  %837 = vmatmul.f32.gmra.mxu3 %v739_v21 }
 0x250   : > { %v674_v22 = vpop.f32.mrf.mxu2 }
 0x251   : > { %v675_v23 = vadd.f32 %v2389_v57, %v674_v22 }
 0x253   : > { %v740_v24 = vmax.f32 %v675_v23, 0.0 }
 0x255   : > { %840 = vmatmul.f32.gmra.mxu3 %v740_v24 }
 0x258   : > { %v677_v25 = vpop.f32.mrf.mxu2 }
 0x259   : > { %v678_v27 = vadd.f32 %v2389_v57, %v677_v25 }
 0x25b   : > { %v741_v28 = vmax.f32 %v678_v27, 0.0 }
 0x25d   : > { %843 = vmatmul.f32.gmra.mxu3 %v741_v28 }
 0x260   : > { %v680_v30 = vpop.f32.mrf.mxu2  ;;  %v796_v31 = vpop.f32.mrf.mxu3 }
 0x261   : > { %v681_v32 = vadd.f32 %v2389_v57, %v680_v30  ;;  %v797_v33 = vadd.f32 %v2425_v2, %v796_v31 }
 0x263   : > { %v742_v34 = vmax.f32 %v681_v32, 0.0  ;;  %v2432_v35 = vsel %vm894_vm0, %v797_v33, -inf }
 0x264   : > { %927 = vmax.xlane.f32.xlu0 %v2432_v35 }
 0x265   : > { %846 = vmatmul.f32.gmra.mxu3 %v742_v34 }
 0x268   : > { %v683_v36 = vpop.f32.mrf.mxu2  ;;  %v799_v37 = vpop.f32.mrf.mxu3 }
 0x269   : > { %v684_v38 = vadd.f32 %v2389_v57, %v683_v36  ;;  %v800_v39 = vadd.f32 %v2425_v2, %v799_v37 }
 0x26b   : > { %v743_v40 = vmax.f32 %v684_v38, 0.0  ;;  %v2439_v41 = vsel %vm894_vm0, %v800_v39, -inf }
 0x26c   : > { %929 = vmax.xlane.f32.xlu0 %v2439_v41 }
 0x26d   : > { %849 = vmatmul.f32.gmra.mxu3 %v743_v40 }
 0x270   : > { %v686_v42 = vpop.f32.mrf.mxu2  ;;  %v802_v43 = vpop.f32.mrf.mxu3 }
 0x271   : > { %v687_v44 = vadd.f32 %v2389_v57, %v686_v42  ;;  %v803_v45 = vadd.f32 %v2425_v2, %v802_v43 }
 0x273   : > { %v744_v46 = vmax.f32 %v687_v44, 0.0  ;;  %v2446_v47 = vsel %vm894_vm0, %v803_v45, -inf }
 0x274   : > { %931 = vmax.xlane.f32.xlu1 %v2446_v47 }
 0x275   : > { %852 = vmatmul.f32.gmra.mxu3 %v744_v46 }
 0x278   : > { %v689_v49 = vpop.f32.mrf.mxu2  ;;  %v805_v50 = vpop.f32.mrf.mxu3 }
 0x279   : > { %v690_v51 = vadd.f32 %v2389_v57, %v689_v49  ;;  %v806_v52 = vadd.f32 %v2425_v2, %v805_v50 }
 0x27b   : > { %v745_v53 = vmax.f32 %v690_v51, 0.0  ;;  %v2453_v54 = vsel %vm894_vm0, %v806_v52, -inf }
 0x27c   : > { %933 = vmax.xlane.f32.xlu1 %v2453_v54 }
 0x27d   : > { %855 = vmatmul.f32.gmra.mxu3 %v745_v53 }
 0x280   : > { %v692_v55 = vpop.f32.mrf.mxu2  ;;  %v808_v56 = vpop.f32.mrf.mxu3 }
 0x281   : > { %v693_v58 = vadd.f32 %v2389_v57, %v692_v55  ;;  %v809_v59 = vadd.f32 %v2425_v2, %v808_v56 }
 0x283   : > { %v746_v60 = vmax.f32 %v693_v58, 0.0  ;;  %v2460_v48 = vsel %vm894_vm0, %v809_v59, -inf }
 0x284   : > { %935 = vmax.xlane.f32.xlu2 %v2460_v48 }
 0x285   : > { %858 = vmatmul.f32.gmra.mxu3 %v746_v60 }
 0x288   : > { %v695_v61 = vpop.f32.mrf.mxu2  ;;  %v811_v62 = vpop.f32.mrf.mxu3 }
 0x289   : > { %v696_v63 = vadd.f32 %v2389_v57, %v695_v61  ;;  %v812_v0 = vadd.f32 %v2425_v2, %v811_v62 }
 0x28b   : > { %v747_v1 = vmax.f32 %v696_v63, 0.0  ;;  %v2467_v3 = vsel %vm894_vm0, %v812_v0, -inf }
 0x28c   : > { %937 = vmax.xlane.f32.xlu2 %v2467_v3 }
 0x28d   : > { %861 = vmatmul.f32.gmra.mxu3 %v747_v1 }
 0x290   : > { %v698_v4 = vpop.f32.mrf.mxu2  ;;  %v814_v5 = vpop.f32.mrf.mxu3 }
 0x291   : > { %v699_v6 = vadd.f32 %v2389_v57, %v698_v4  ;;  %v815_v7 = vadd.f32 %v2425_v2, %v814_v5 }
 0x293   : > { %v748_v8 = vmax.f32 %v699_v6, 0.0  ;;  %v2474_v9 = vsel %vm894_vm0, %v815_v7, -inf }
 0x294   : > { %939 = vmax.xlane.f32.xlu0 %v2474_v9 }
 0x295   : > { %864 = vmatmul.f32.gmra.mxu3 %v748_v8 }
 0x298   : > { %v701_v10 = vpop.f32.mrf.mxu2  ;;  %v817_v11 = vpop.f32.mrf.mxu3 }
 0x299   : > { %v702_v12 = vadd.f32 %v2389_v57, %v701_v10  ;;  %v818_v13 = vadd.f32 %v2425_v2, %v817_v11 }
 0x29b   : > { %v749_v14 = vmax.f32 %v702_v12, 0.0  ;;  %v2481_v15 = vsel %vm894_vm0, %v818_v13, -inf }
 0x29c   : > { %941 = vmax.xlane.f32.xlu1 %v2481_v15 }
 0x29d   : > { %867 = vmatmul.f32.gmra.mxu3 %v749_v14 }
 0x2a0   : > { %v704_v16 = vpop.f32.mrf.mxu2  ;;  %v820_v17 = vpop.f32.mrf.mxu3 }
 0x2a1   : > { %v705_v18 = vadd.f32 %v2389_v57, %v704_v16  ;;  %v821_v19 = vadd.f32 %v2425_v2, %v820_v17 }
 0x2a3   : > { %v750_v20 = vmax.f32 %v705_v18, 0.0  ;;  %v2488_v21 = vsel %vm894_vm0, %v821_v19, -inf }
 0x2a4   : > { %943 = vmax.xlane.f32.xlu2 %v2488_v21 }
 0x2a5   : > { %870 = vmatmul.f32.gmra.mxu3 %v750_v20 }
 0x2a8   : > { %v707_v22 = vpop.f32.mrf.mxu2  ;;  %v823_v23 = vpop.f32.mrf.mxu3 }
 0x2a9   : > { %v708_v24 = vadd.f32 %v2389_v57, %v707_v22  ;;  %v824_v25 = vadd.f32 %v2425_v2, %v823_v23 }
 0x2ab   : > { %v751_v26 = vmax.f32 %v708_v24, 0.0  ;;  %v2495_v27 = vsel %vm894_vm0, %v824_v25, -inf }
 0x2ac   : > { %945 = vmax.xlane.f32.xlu0 %v2495_v27 }
 0x2ad   : > { %873 = vmatmul.f32.gmra.mxu3 %v751_v26 }
 0x2b0   : > { %v710_v28 = vpop.f32.mrf.mxu2  ;;  %v826_v30 = vpop.f32.mrf.mxu3 }
 0x2b1   : > { %v711_v31 = vadd.f32 %v2389_v57, %v710_v28  ;;  %v827_v32 = vadd.f32 %v2425_v2, %v826_v30 }
 0x2b3   : > { %v752_v33 = vmax.f32 %v711_v31, 0.0  ;;  %v2502_v34 = vsel %vm894_vm0, %v827_v32, -inf }
 0x2b4   : > { %947 = vmax.xlane.f32.xlu1 %v2502_v34 }
 0x2b5   : > { %876 = vmatmul.f32.gmra.mxu3 %v752_v33 }
 0x2b8   : > { %v713_v36 = vpop.f32.mrf.mxu2  ;;  %v829_v37 = vpop.f32.mrf.mxu3 }
 0x2b9   : > { %v714_v38 = vadd.f32 %v2389_v57, %v713_v36  ;;  %v830_v39 = vadd.f32 %v2425_v2, %v829_v37 }
 0x2bb   : > { %v753_v40 = vmax.f32 %v714_v38, 0.0  ;;  %v2509_v42 = vsel %vm894_vm0, %v830_v39, -inf }
 0x2bc   : > { %949 = vmax.xlane.f32.xlu2 %v2509_v42 }
 0x2bd   : > { %879 = vmatmul.f32.gmra.mxu3 %v753_v40 }
 0x2c0   : > { %v716_v43 = vpop.f32.mrf.mxu2  ;;  %v832_v44 = vpop.f32.mrf.mxu3 }
 0x2c1   : > { %v717_v45 = vadd.f32 %v2389_v57, %v716_v43  ;;  %v833_v46 = vadd.f32 %v2425_v2, %v832_v44 }
 0x2c3   : > { %v754_v49 = vmax.f32 %v717_v45, 0.0  ;;  %v2516_v50 = vsel %vm894_vm0, %v833_v46, -inf }
 0x2c4   : > { %951 = vmax.xlane.f32.xlu0 %v2516_v50 }
 0x2c5   : > { %882 = vmatmul.f32.gmra.mxu3 %v754_v49 }
 0x2c8   : > { %v719_v51 = vpop.f32.mrf.mxu2  ;;  %v835_v52 = vpop.f32.mrf.mxu3 }
 0x2c9   : > { %v720_v53 = vadd.f32 %v2389_v57, %v719_v51  ;;  %v836_v55 = vadd.f32 %v2425_v2, %v835_v52 }
 0x2cb   : > { %v755_v56 = vmax.f32 %v720_v53, 0.0  ;;  %v2523_v58 = vsel %vm894_vm0, %v836_v55, -inf }
 0x2cc   : > { %953 = vmax.xlane.f32.xlu1 %v2523_v58 }
 0x2cd   : > { %885 = vmatmul.f32.gmra.mxu3 %v755_v56 }
 0x2d0   : > { %v722_v59 = vpop.f32.mrf.mxu2  ;;  %v838_v60 = vpop.f32.mrf.mxu3 }
 0x2d1   : > { %v723_v61 = vadd.f32 %v2389_v57, %v722_v59  ;;  %v839_v62 = vadd.f32 %v2425_v2, %v838_v60 }
 0x2d3   : > { %v756_v63 = vmax.f32 %v723_v61, 0.0  ;;  %v2530_v0 = vsel %vm894_vm0, %v839_v62, -inf }
 0x2d4   : > { %955 = vmax.xlane.f32.xlu2 %v2530_v0 }
 0x2d5   : > { %888 = vmatmul.f32.gmra.mxu3 %v756_v63 }
 0x2d7   : > { %v928_v1 = vpop.xlane.xlu0 %927 }
 0x2d8   : > { %v991_v4 = vsub.f32 %v2432_v35, %v928_v1  ;;  %v841_v5 = vpop.f32.mrf.mxu3 }
 0x2d9   : > { %v842_v6 = vadd.f32 %v2425_v2, %v841_v5 }
 0x2da   : > { %v1023_v7 = vmul.f32 1.442695, %v991_v4 }
 0x2db   : > { %v2537_v57 = vsel %vm894_vm0, %v842_v6, -inf }
 0x2dc   : > { %1868 = vpow2.f32 %v1023_v7  ;;  %957 = vmax.xlane.f32.xlu0 %v2537_v57 }
 0x2df   : > { %v930_v8 = vpop.xlane.xlu0 %929 }
 0x2e0   : > { %v992_v10 = vsub.f32 %v2439_v41, %v930_v8  ;;  %v844_v11 = vpop.f32.mrf.mxu3 }
 0x2e1   : > { %v845_v12 = vadd.f32 %v2425_v2, %v844_v11 }
 0x2e2   : > { %v2542_v13 = vpop.eup %1868  ;;  %v1025_v35 = vmul.f32 1.442695, %v992_v10 }
 0x2e3   : > { %1087 = vadd.xlane.f32.xlu2 %v2542_v13  ;;  %v2547_v14 = vsel %vm894_vm0, %v845_v12, -inf }
 0x2e4   : > { %1870 = vpow2.f32 %v1025_v35  ;;  %959 = vmax.xlane.f32.xlu1 %v2547_v14 }
 0x2e7   : > { %v932_v16 = vpop.xlane.xlu1 %931 }
 0x2e8   : > { %v993_v17 = vsub.f32 %v2446_v47, %v932_v16  ;;  %v847_v18 = vpop.f32.mrf.mxu3 }
 0x2e9   : > { %v848_v41 = vadd.f32 %v2425_v2, %v847_v18 }
 0x2ea   : > { %v2552_v19 = vpop.eup %1870  ;;  %v1027_v20 = vmul.f32 1.442695, %v993_v17 }
 0x2eb   : > { %1089 = vadd.xlane.f32.xlu0 %v2552_v19  ;;  %v2557_v22 = vsel %vm894_vm0, %v848_v41, -inf }
 0x2ec   : > { %1872 = vpow2.f32 %v1027_v20  ;;  %961 = vmax.xlane.f32.xlu2 %v2557_v22 }
 0x2ef   : > { %v934_v23 = vpop.xlane.xlu1 %933 }
 0x2f0   : > { %v994_v24 = vsub.f32 %v2453_v54, %v934_v23  ;;  %v850_v25 = vpop.f32.mrf.mxu3 }
 0x2f1   : > { %v851_v47 = vadd.f32 %v2425_v2, %v850_v25 }
 0x2f2   : > { %v2562_v26 = vpop.eup %1872  ;;  %v1029_v28 = vmul.f32 1.442695, %v994_v24 }
 0x2f3   : > { %1091 = vadd.xlane.f32.xlu1 %v2562_v26  ;;  %v2567_v30 = vsel %vm894_vm0, %v851_v47, -inf }
 0x2f4   : > { %1874 = vpow2.f32 %v1029_v28  ;;  %963 = vmax.xlane.f32.xlu0 %v2567_v30 }
 0x2f7   : > { %v936_v31 = vpop.xlane.xlu2 %935 }
 0x2f8   : > { %v995_v32 = vsub.f32 %v2460_v48, %v936_v31  ;;  %v853_v33 = vpop.f32.mrf.mxu3 }
 0x2f9   : > { %v854_v54 = vadd.f32 %v2425_v2, %v853_v33 }
 0x2fa   : > { %v2572_v36 = vpop.eup %1874  ;;  %v1031_v37 = vmul.f32 1.442695, %v995_v32 }
 0x2fb   : > { %1093 = vadd.xlane.f32.xlu2 %v2572_v36  ;;  %v2577_v38 = vsel %vm894_vm0, %v854_v54, -inf }
 0x2fc   : > { %1876 = vpow2.f32 %v1031_v37  ;;  %965 = vmax.xlane.f32.xlu1 %v2577_v38 }
 0x2ff   : > { %v938_v39 = vpop.xlane.xlu2 %937 }
 0x300   : > { %v996_v40 = vsub.f32 %v2467_v3, %v938_v39  ;;  %v856_v43 = vpop.f32.mrf.mxu3 }
 0x301   : > { %v857_v48 = vadd.f32 %v2425_v2, %v856_v43 }
 0x302   : > { %v2582_v44 = vpop.eup %1876  ;;  %v1033_v45 = vmul.f32 1.442695, %v996_v40 }
 0x303   : > { %1095 = vadd.xlane.f32.xlu0 %v2582_v44  ;;  %v2587_v46 = vsel %vm894_vm0, %v857_v48, -inf }
 0x304   : > { %1878 = vpow2.f32 %v1033_v45  ;;  %967 = vmax.xlane.f32.xlu2 %v2587_v46 }
 0x307   : > { %v940_v49 = vpop.xlane.xlu0 %939 }
 0x308   : > { %v997_v51 = vsub.f32 %v2474_v9, %v940_v49  ;;  %v859_v52 = vpop.f32.mrf.mxu3 }
 0x309   : > { %v860_v3 = vadd.f32 %v2425_v2, %v859_v52 }
 0x30a   : > { %v2592_v53 = vpop.eup %1878  ;;  %v1035_v55 = vmul.f32 1.442695, %v997_v51 }
 0x30b   : > { %1097 = vadd.xlane.f32.xlu1 %v2592_v53  ;;  %v2597_v56 = vsel %vm894_vm0, %v860_v3, -inf }
 0x30c   : > { %1880 = vpow2.f32 %v1035_v55  ;;  %969 = vmax.xlane.f32.xlu0 %v2597_v56 }
 0x30f   : > { %v942_v59 = vpop.xlane.xlu1 %941 }
 0x310   : > { %v998_v60 = vsub.f32 %v2481_v15, %v942_v59  ;;  %v862_v61 = vpop.f32.mrf.mxu3 }
 0x311   : > { %v863_v9 = vadd.f32 %v2425_v2, %v862_v61 }
 0x312   : > { %v2602_v62 = vpop.eup %1880  ;;  %v1037_v63 = vmul.f32 1.442695, %v998_v60 }
 0x313   : > { %1099 = vadd.xlane.f32.xlu2 %v2602_v62  ;;  %v2607_v1 = vsel %vm894_vm0, %v863_v9, -inf }
 0x314   : > { %1882 = vpow2.f32 %v1037_v63  ;;  %971 = vmax.xlane.f32.xlu1 %v2607_v1 }
 0x317   : > { %v944_v4 = vpop.xlane.xlu2 %943 }
 0x318   : > { %v999_v5 = vsub.f32 %v2488_v21, %v944_v4  ;;  %v865_v6 = vpop.f32.mrf.mxu3 }
 0x319   : > { %v866_v15 = vadd.f32 %v2425_v2, %v865_v6 }
 0x31a   : > { %v2612_v7 = vpop.eup %1882  ;;  %v1039_v8 = vmul.f32 1.442695, %v999_v5 }
 0x31b   : > { %1101 = vadd.xlane.f32.xlu0 %v2612_v7  ;;  %v2617_v10 = vsel %vm894_vm0, %v866_v15, -inf }
 0x31c   : > { %1884 = vpow2.f32 %v1039_v8  ;;  %973 = vmax.xlane.f32.xlu2 %v2617_v10 }
 0x31f   : > { %v946_v11 = vpop.xlane.xlu0 %945 }
 0x320   : > { %v1000_v12 = vsub.f32 %v2495_v27, %v946_v11  ;;  %v868_v35 = vpop.f32.mrf.mxu3 }
 0x321   : > { %v869_v21 = vadd.f32 %v2425_v2, %v868_v35 }
 0x322   : > { %v2622_v16 = vpop.eup %1884  ;;  %v1041_v17 = vmul.f32 1.442695, %v1000_v12 }
 0x323   : > { %1103 = vadd.xlane.f32.xlu1 %v2622_v16  ;;  %v2627_v18 = vsel %vm894_vm0, %v869_v21, -inf }
 0x324   : > { %1886 = vpow2.f32 %v1041_v17  ;;  %975 = vmax.xlane.f32.xlu0 %v2627_v18 }
 0x327   : > { %v948_v41 = vpop.xlane.xlu1 %947 }
 0x328   : > { %v1001_v20 = vsub.f32 %v2502_v34, %v948_v41  ;;  %v871_v23 = vpop.f32.mrf.mxu3 }
 0x329   : > { %v872_v27 = vadd.f32 %v2425_v2, %v871_v23 }
 0x32a   : > { %v2632_v24 = vpop.eup %1886  ;;  %v1043_v25 = vmul.f32 1.442695, %v1001_v20 }
 0x32b   : > { %1105 = vadd.xlane.f32.xlu2 %v2632_v24  ;;  %v2637_v47 = vsel %vm894_vm0, %v872_v27, -inf }
 0x32c   : > { %1888 = vpow2.f32 %v1043_v25  ;;  %977 = vmax.xlane.f32.xlu1 %v2637_v47 }
 0x32f   : > { %v950_v49 = vpop.xlane.xlu2 %949 }
 0x330   : > { %v874_v28 = vpop.f32.mrf.mxu3 }
 0x331   : > { %v875_v31 = vadd.f32 %v2425_v2, %v874_v28 }
 0x332   : > { %v2641_v32 = vpop.eup %1888 }
 0x333   : > { %1107 = vadd.xlane.f32.xlu0 %v2641_v32  ;;  %v2646_v34 = vsel %vm894_vm0, %v875_v31, -inf }
 0x334   : > { %979 = vmax.xlane.f32.xlu2 %v2646_v34 }
 0x337   : > { %v952_v43 = vpop.xlane.xlu0 %951 }
 0x338   : > { %v877_v33 = vpop.f32.mrf.mxu3  ;;  %v1003_v45 = vsub.f32 %v2516_v50, %v952_v43 }
 0x339   : > { %v878_v54 = vadd.f32 %v2425_v2, %v877_v33 }
 0x33a   : > { %v1047_v52 = vmul.f32 1.442695, %v1003_v45 }
 0x33b   : > { %v2652_v37 = vsel %vm894_vm0, %v878_v54, -inf }
 0x33c   : > { %981 = vmax.xlane.f32.xlu0 %v2652_v37  ;;  %1890 = vpow2.f32 %v1047_v52 }
 0x33f   : > { %v954_v55 = vpop.xlane.xlu1 %953 }
 0x340   : > { %v880_v39 = vpop.f32.mrf.mxu3  ;;  %v1004_v60 = vsub.f32 %v2523_v58, %v954_v55  ;;  %v1002_v58 = vsub.f32 %v2509_v42, %v950_v49 }
 0x341   : > { %v881_v40 = vadd.f32 %v2425_v2, %v880_v39 }
 0x342   : > { %v1049_v4 = vmul.f32 1.442695, %v1004_v60  ;;  %v2671_v15 = vpop.eup %1890  ;;  %v1045_v21 = vmul.f32 1.442695, %v1002_v58 }
 0x343   : > { %v2658_v48 = vsel %vm894_vm0, %v881_v40, -inf }
 0x344   : > { %983 = vmax.xlane.f32.xlu1 %v2658_v48 }
 0x347   : > { %v956_v61 = vpop.xlane.xlu2 %955 }
 0x348   : > { %v883_v51 = vpop.f32.mrf.mxu3 }
 0x349   : > { %v884_v3 = vadd.f32 %v2425_v2, %v883_v51 }
 0x34b   : > { %v2665_v59 = vsel %vm894_vm0, %v884_v3, -inf }
 0x34c   : > { %985 = vmax.xlane.f32.xlu2 %v2665_v59 }
 0x34f   : > { %v958_v9 = vpop.xlane.xlu0 %957 }
 0x350   : > { %v1006_v63 = vsub.f32 %v2537_v57, %v958_v9  ;;  %v886_v50 = vpop.f32.mrf.mxu3 }
 0x351   : > { %v887_v5 = vadd.f32 %v2425_v2, %v886_v50 }
 0x352   : > { %v1053_v6 = vmul.f32 1.442695, %v1006_v63 }
 0x353   : > { %v2675_v8 = vsel %vm894_vm0, %v887_v5, -inf }
 0x354   : > { %1892 = vpow2.f32 %v1053_v6  ;;  %987 = vmax.xlane.f32.xlu0 %v2675_v8  ;;  %1111 = vadd.xlane.f32.xlu2 %v2671_v15 }
 0x355   : > { %1894 = vpow2.f32 %v1049_v4 }
 0x356   : > { %v1088_v57 = vpop.xlane.xlu2 %1087 }
 0x357   : > { %1896 = vrcp.f32 %v1088_v57  ;;  %v960_v11 = vpop.xlane.xlu1 %959  ;;  %v1162_v33 = vand.u32 2147483648, %v1088_v57  ;;  %v1160_v39 = vand.u32 2147483647, %v1088_v57  ;;  %vm1156_vm2 = vweird.f32 %v1088_v57 }
 0x358   : > { %v1007_v12 = vsub.f32 %v2547_v14, %v960_v11  ;;  %v889_v35 = vpop.f32.mrf.mxu3  ;;  %v1005_v14 = vsub.f32 %v2530_v0, %v956_v61 }
 0x359   : > { %v890_v17 = vadd.f32 %v2425_v2, %v889_v35  ;;  %v1163_v49 = vor.u32 1.1754944e-38, %v1162_v33  ;;  %vm1161_vm4 = vcmp.eq.f32.partialorder %v1160_v39, 8.507059e+37 }
 0x35a   : > { %v2682_v41 = vpop.eup %1892  ;;  %v1055_v20 = vmul.f32 1.442695, %v1007_v12  ;;  %v1051_v31 = vmul.f32 1.442695, %v1005_v14 }
 0x35b   : > { %v2684_v23 = vpop.eup %1894  ;;  %v2688_v27 = vsel %vm894_vm0, %v890_v17, -inf }
 0x35c   : > { %1898 = vpow2.f32 %v1055_v20  ;;  %989 = vmax.xlane.f32.xlu1 %v2688_v27  ;;  %1113 = vadd.xlane.f32.xlu0 %v2684_v23 }
 0x35d   : > { %v1897_v42 = vpop.eup %1896  ;;  %1900 = vpow2.f32 %v1045_v21  ;;  %1117 = vadd.xlane.f32.xlu2 %v2682_v41 }
 0x35e   : > { %v1152_v2 = vmul.f32 %v1897_v42, %v1088_v57  ;;  %v1090_v25 = vpop.xlane.xlu0 %1089  ;;  %vm1157_vm1 = vweird.f32 %v1897_v42 }
 0x35f   : > { %1902 = vrcp.f32 %v1090_v25  ;;  %v962_v40 = vpop.xlane.xlu2 %961  ;;  %vm1158_vm3 = vmor %vm1156_vm2, %vm1157_vm1  ;;  %v1176_v4 = vand.u32 2147483648, %v1090_v25  ;;  %v1174_v6 = vand.u32 2147483647, %v1090_v25  ;;  %vm1170_vm6 = vweird.f32 %v1090_v25 }
 0x360   : > { %v1153_v28 = vsub.f32 1.0, %v1152_v2  ;;  %1904 = vpow2.f32 %v1051_v31  ;;  %v1008_v51 = vsub.f32 %v2557_v22, %v962_v40 }
 0x361   : > { %vm1175_vm8 = vcmp.eq.f32.partialorder %v1174_v6, 8.507059e+37 }
 0x362   : > { %v2694_v29 = vpop.eup %1898  ;;  %v1154_v54 = vmul.f32 %v1897_v42, %v1153_v28  ;;  %v1057_v5 = vmul.f32 1.442695, %v1008_v51 }
 0x363   : > { %v2696_v43 = vpop.eup %1900 }
 0x364   : > { %v1155_v45 = vadd.f32 %v1897_v42, %v1154_v54  ;;  %1109 = vadd.xlane.f32.xlu1 %v2696_v43  ;;  %1119 = vadd.xlane.f32.xlu0 %v2694_v29 }
 0x365   : > { %v1903_v0 = vpop.eup %1902 }
 0x366   : > { %v1159_v52 = vsel %vm1158_vm3, %v1897_v42, %v1155_v45  ;;  %v1166_v3 = vmul.f32 %v1903_v0, %v1090_v25  ;;  %v1092_v55 = vpop.xlane.xlu1 %1091  ;;  %vm1171_vm5 = vweird.f32 %v1903_v0  ;;  %v2708_v57 = vpop.eup %1904 }
 0x367   : > { %v1164_v60 = vsel %vm1161_vm4, %v1163_v49, %v1159_v52  ;;  %1906 = vrcp.f32 %v1092_v55  ;;  %v964_v61 = vpop.xlane.xlu0 %963  ;;  %vm1172_vm7 = vmor %vm1170_vm6, %vm1171_vm5  ;;  %v1190_v25 = vand.u32 2147483648, %v1092_v55  ;;  %v1188_v33 = vand.u32 2147483647, %v1092_v55 }
 0x368   : > { %v1599_v9 = vmul.f32 %v2542_v13, %v1164_v60  ;;  %v1167_v63 = vsub.f32 1.0, %v1166_v3  ;;  %v1009_v50 = vsub.f32 %v2567_v30, %v964_v61  ;;  %v1177_v30 = vor.u32 1.1754944e-38, %v1176_v4 }
 0x369   : > { %vm1184_vm10 = vweird.f32 %v1092_v55  ;;  %vm1189_vm12 = vcmp.eq.f32.partialorder %v1188_v33, 8.507059e+37 }
 0x36a   : > { %1631 = vst [vmem:[%s2705_s18] sm:$0xff] %v1599_v9  ;;  %v1168_v22 = vmul.f32 %v1903_v0, %v1167_v63  ;;  %v1059_v58 = vmul.f32 1.442695, %v1009_v50 }
 0x36c   : > { %v1169_v11 = vadd.f32 %v1903_v0, %v1168_v22  ;;  %1908 = vpow2.f32 %v1059_v58  ;;  %1115 = vadd.xlane.f32.xlu1 %v2708_v57 }
 0x36d   : > { %v1907_v13 = vpop.eup %1906  ;;  %1910 = vpow2.f32 %v1057_v5 }
 0x36e   : > { %v1173_v12 = vsel %vm1172_vm7, %v1903_v0, %v1169_v11  ;;  %v1180_v35 = vmul.f32 %v1907_v13, %v1092_v55  ;;  %v1094_v21 = vpop.xlane.xlu2 %1093  ;;  %vm1185_vm9 = vweird.f32 %v1907_v13 }
 0x36f   : > { %v1178_v17 = vsel %vm1175_vm8, %v1177_v30, %v1173_v12  ;;  %1912 = vrcp.f32 %v1094_v21  ;;  %v966_v20 = vpop.xlane.xlu1 %965  ;;  %vm1186_vm11 = vmor %vm1184_vm10, %vm1185_vm9  ;;  %v1204_v55 = vand.u32 2147483648, %v1094_v21  ;;  %v1202_v50 = vand.u32 2147483647, %v1094_v21 }
 0x370   : > { %v1600_v42 = vmul.f32 %v2552_v19, %v1178_v17  ;;  %v1181_v14 = vsub.f32 1.0, %v1180_v35  ;;  %v1010_v2 = vsub.f32 %v2577_v38, %v966_v20  ;;  %v1191_v38 = vor.u32 1.1754944e-38, %v1190_v25 }
 0x371   : > { %vm1198_vm14 = vweird.f32 %v1094_v21  ;;  %vm1203_vm0 = vcmp.eq.f32.partialorder %v1202_v50, 8.507059e+37 }
 0x372   : > { %v2713_v28 = vpop.eup %1908  ;;  %1632 = vst [vmem:[%s2705_s18 + $0x8] sm:$0xff] %v1600_v42  ;;  %v1182_v31 = vmul.f32 %v1907_v13, %v1181_v14  ;;  %v1061_v54 = vmul.f32 1.442695, %v1010_v2 }
 0x373   : > { %v2716_v39 = vpop.eup %1910  ;;  %1123 = vadd.xlane.f32.xlu2 %v2713_v28 }
 0x374   : > { %v1183_v40 = vadd.f32 %v1907_v13, %v1182_v31  ;;  %1914 = vpow2.f32 %v1061_v54  ;;  %1121 = vadd.xlane.f32.xlu1 %v2716_v39 }
 0x375   : > { %v1913_v19 = vpop.eup %1912 }
 0x376   : > { %v1187_v45 = vsel %vm1186_vm11, %v1907_v13, %v1183_v40  ;;  %v1194_v0 = vmul.f32 %v1913_v19, %v1094_v21  ;;  %v1096_v49 = vpop.xlane.xlu0 %1095  ;;  %vm1199_vm13 = vweird.f32 %v1913_v19 }
 0x377   : > { %v1192_v51 = vsel %vm1189_vm12, %v1191_v38, %v1187_v45  ;;  %1916 = vrcp.f32 %v1096_v49  ;;  %v968_v52 = vpop.xlane.xlu2 %967  ;;  %vm1200_vm15 = vmor %vm1198_vm14, %vm1199_vm13  ;;  %v1218_v17 = vand.u32 2147483648, %v1096_v49  ;;  %v1216_v42 = vand.u32 2147483647, %v1096_v49 }
 0x378   : > { %v1601_v3 = vmul.f32 %v2562_v26, %v1192_v51  ;;  %v1195_v60 = vsub.f32 1.0, %v1194_v0  ;;  %v1011_v61 = vsub.f32 %v2587_v46, %v968_v52  ;;  %v1205_v26 = vor.u32 1.1754944e-38, %v1204_v55 }
 0x379   : > { %vm1212_vm2 = vweird.f32 %v1096_v49  ;;  %vm1217_vm4 = vcmp.eq.f32.partialorder %v1216_v42, 8.507059e+37 }
 0x37a   : > { %v2722_v9 = vpop.eup %1914  ;;  %1633 = vst [vmem:[%s2705_s18 + $0x10] sm:$0xff] %v1601_v3  ;;  %v1196_v63 = vmul.f32 %v1913_v19, %v1195_v60  ;;  %v1063_v4 = vmul.f32 1.442695, %v1011_v61 }
 0x37b   : > { %1125 = vadd.xlane.f32.xlu0 %v2722_v9 }
 0x37c   : > { %v1197_v5 = vadd.f32 %v1913_v19, %v1196_v63  ;;  %1918 = vpow2.f32 %v1063_v4 }
 0x37d   : > { %v1917_v22 = vpop.eup %1916 }
 0x37e   : > { %v1201_v6 = vsel %vm1200_vm15, %v1913_v19, %v1197_v5  ;;  %v1208_v46 = vmul.f32 %v1917_v22, %v1096_v49  ;;  %v1098_v58 = vpop.xlane.xlu1 %1097  ;;  %vm1213_vm1 = vweird.f32 %v1917_v22 }
 0x37f   : > { %v1206_v11 = vsel %vm1203_vm0, %v1205_v26, %v1201_v6  ;;  %1920 = vrcp.f32 %v1098_v58  ;;  %v970_v13 = vpop.xlane.xlu0 %969  ;;  %vm1214_vm3 = vmor %vm1212_vm2, %vm1213_vm1  ;;  %v1232_v0 = vand.u32 2147483648, %v1098_v58  ;;  %v1230_v52 = vand.u32 2147483647, %v1098_v58 }
 0x380   : > { %v1602_v30 = vmul.f32 %v2572_v36, %v1206_v11  ;;  %v1209_v12 = vsub.f32 1.0, %v1208_v46  ;;  %v1012_v35 = vsub.f32 %v2597_v56, %v970_v13  ;;  %v1219_v36 = vor.u32 1.1754944e-38, %v1218_v17 }
 0x381   : > { %vm1226_vm6 = vweird.f32 %v1098_v58  ;;  %vm1231_vm8 = vcmp.eq.f32.partialorder %v1230_v52, 8.507059e+37 }
 0x382   : > { %v2728_v20 = vpop.eup %1918  ;;  %1634 = vst [vmem:[%s2705_s18 + $0x18] sm:$0xff] %v1602_v30  ;;  %v1210_v21 = vmul.f32 %v1917_v22, %v1209_v12  ;;  %v1065_v14 = vmul.f32 1.442695, %v1012_v35 }
 0x383   : > { %1127 = vadd.xlane.f32.xlu1 %v2728_v20 }
 0x384   : > { %v1211_v2 = vadd.f32 %v1917_v22, %v1210_v21  ;;  %1922 = vpow2.f32 %v1065_v14 }
 0x385   : > { %v1921_v25 = vpop.eup %1920 }
 0x386   : > { %v1215_v31 = vsel %vm1214_vm3, %v1917_v22, %v1211_v2  ;;  %v1222_v56 = vmul.f32 %v1921_v25, %v1098_v58  ;;  %v1100_v33 = vpop.xlane.xlu2 %1099  ;;  %vm1227_vm5 = vweird.f32 %v1921_v25 }
 0x387   : > { %v1220_v54 = vsel %vm1217_vm4, %v1219_v36, %v1215_v31  ;;  %1924 = vrcp.f32 %v1100_v33  ;;  %v972_v40 = vpop.xlane.xlu1 %971  ;;  %vm1228_vm7 = vmor %vm1226_vm6, %vm1227_vm5  ;;  %v1246_v6 = vand.u32 2147483648, %v1100_v33  ;;  %v1244_v11 = vand.u32 2147483647, %v1100_v33 }
 0x388   : > { %v1603_v19 = vmul.f32 %v2582_v44, %v1220_v54  ;;  %v1223_v38 = vsub.f32 1.0, %v1222_v56  ;;  %v1013_v45 = vsub.f32 %v2607_v1, %v972_v40  ;;  %v1233_v44 = vor.u32 1.1754944e-38, %v1232_v0 }
 0x389   : > { %vm1240_vm10 = vweird.f32 %v1100_v33  ;;  %vm1245_vm12 = vcmp.eq.f32.partialorder %v1244_v11, 8.507059e+37 }
 0x38a   : > { %v2734_v51 = vpop.eup %1922  ;;  %1635 = vst [vmem:[%s2705_s18 + $0x20] sm:$0xff] %v1603_v19  ;;  %v1224_v49 = vmul.f32 %v1921_v25, %v1223_v38  ;;  %v1067_v3 = vmul.f32 1.442695, %v1013_v45 }
 0x38b   : > { %1129 = vadd.xlane.f32.xlu2 %v2734_v51 }
 0x38c   : > { %v1225_v60 = vadd.f32 %v1921_v25, %v1224_v49  ;;  %1926 = vpow2.f32 %v1067_v3 }
 0x38d   : > { %v1925_v61 = vpop.eup %1924 }
 0x38e   : > { %v1229_v55 = vsel %vm1228_vm7, %v1921_v25, %v1225_v60  ;;  %v1236_v1 = vmul.f32 %v1925_v61, %v1100_v33  ;;  %v1102_v63 = vpop.xlane.xlu0 %1101  ;;  %vm1241_vm9 = vweird.f32 %v1925_v61 }
 0x38f   : > { %v1234_v50 = vsel %vm1231_vm8, %v1233_v44, %v1229_v55  ;;  %1928 = vrcp.f32 %v1102_v63  ;;  %v974_v4 = vpop.xlane.xlu2 %973  ;;  %vm1242_vm11 = vmor %vm1240_vm10, %vm1241_vm9  ;;  %v1260_v36 = vand.u32 2147483648, %v1102_v63  ;;  %v1258_v33 = vand.u32 2147483647, %v1102_v63 }
 0x390   : > { %v1604_v5 = vmul.f32 %v2592_v53, %v1234_v50  ;;  %v1237_v22 = vsub.f32 1.0, %v1236_v1  ;;  %v1014_v26 = vsub.f32 %v2617_v10, %v974_v4  ;;  %v1247_v53 = vor.u32 1.1754944e-38, %v1246_v6 }
 0x391   : > { %vm1254_vm14 = vweird.f32 %v1102_v63  ;;  %vm1259_vm0 = vcmp.eq.f32.partialorder %v1258_v33, 8.507059e+37 }
 0x392   : > { %v2740_v46 = vpop.eup %1926  ;;  %1636 = vst [vmem:[%s2705_s18 + $0x28] sm:$0xff] %v1604_v5  ;;  %v1238_v58 = vmul.f32 %v1925_v61, %v1237_v22  ;;  %v1069_v13 = vmul.f32 1.442695, %v1014_v26 }
 0x393   : > { %1131 = vadd.xlane.f32.xlu0 %v2740_v46 }
 0x394   : > { %v1239_v30 = vadd.f32 %v1925_v61, %v1238_v58  ;;  %1930 = vpow2.f32 %v1069_v13 }
 0x395   : > { %v1929_v12 = vpop.eup %1928 }
 0x396   : > { %v1243_v35 = vsel %vm1242_vm11, %v1925_v61, %v1239_v30  ;;  %v1250_v10 = vmul.f32 %v1929_v12, %v1102_v63  ;;  %v1104_v17 = vpop.xlane.xlu1 %1103  ;;  %vm1255_vm13 = vweird.f32 %v1929_v12 }
 0x397   : > { %v1248_v21 = vsel %vm1245_vm12, %v1247_v53, %v1243_v35  ;;  %1932 = vrcp.f32 %v1104_v17  ;;  %v976_v42 = vpop.xlane.xlu0 %975  ;;  %vm1256_vm15 = vmor %vm1254_vm14, %vm1255_vm13  ;;  %v1274_v61 = vand.u32 2147483648, %v1104_v17  ;;  %v1272_v1 = vand.u32 2147483647, %v1104_v17 }
 0x398   : > { %v1605_v14 = vmul.f32 %v2602_v62, %v1248_v21  ;;  %v1251_v2 = vsub.f32 1.0, %v1250_v10  ;;  %v1015_v25 = vsub.f32 %v2627_v18, %v976_v42  ;;  %v1261_v62 = vor.u32 1.1754944e-38, %v1260_v36 }
 0x399   : > { %vm1268_vm2 = vweird.f32 %v1104_v17  ;;  %vm1273_vm4 = vcmp.eq.f32.partialorder %v1272_v1, 8.507059e+37 }
 0x39a   : > { %v2746_v31 = vpop.eup %1930  ;;  %1637 = vst [vmem:[%s2705_s18 + $0x30] sm:$0xff] %v1605_v14  ;;  %v1252_v56 = vmul.f32 %v1929_v12, %v1251_v2  ;;  %v1071_v54 = vmul.f32 1.442695, %v1015_v25 }
 0x39b   : > { %1133 = vadd.xlane.f32.xlu1 %v2746_v31 }
 0x39c   : > { %v1253_v40 = vadd.f32 %v1929_v12, %v1252_v56  ;;  %1934 = vpow2.f32 %v1071_v54 }
 0x39d   : > { %v1933_v19 = vpop.eup %1932 }
 0x39e   : > { %v1257_v38 = vsel %vm1256_vm15, %v1929_v12, %v1253_v40  ;;  %v1264_v18 = vmul.f32 %v1933_v19, %v1104_v17  ;;  %v1106_v45 = vpop.xlane.xlu2 %1105  ;;  %vm1269_vm1 = vweird.f32 %v1933_v19 }
 0x39f   : > { %v1262_v0 = vsel %vm1259_vm0, %v1261_v62, %v1257_v38  ;;  %1936 = vrcp.f32 %v1106_v45  ;;  %v978_v49 = vpop.xlane.xlu1 %977  ;;  %vm1270_vm3 = vmor %vm1268_vm2, %vm1269_vm1  ;;  %v1288_v30 = vand.u32 2147483648, %v1106_v45  ;;  %v1286_v35 = vand.u32 2147483647, %v1106_v45 }
 0x3a0   : > { %v1606_v52 = vmul.f32 %v2612_v7, %v1262_v0  ;;  %v1265_v3 = vsub.f32 1.0, %v1264_v18  ;;  %v1016_v60 = vsub.f32 %v2637_v47, %v978_v49  ;;  %v1275_v7 = vor.u32 1.1754944e-38, %v1274_v61 }
 0x3a1   : > { %vm1282_vm6 = vweird.f32 %v1106_v45  ;;  %vm1287_vm8 = vcmp.eq.f32.partialorder %v1286_v35, 8.507059e+37 }
 0x3a2   : > { %v2752_v44 = vpop.eup %1934  ;;  %1638 = vst [vmem:[%s2705_s18 + $0x38] sm:$0xff] %v1606_v52  ;;  %v1266_v55 = vmul.f32 %v1933_v19, %v1265_v3  ;;  %v1073_v63 = vmul.f32 1.442695, %v1016_v60 }
 0x3a3   : > { %1135 = vadd.xlane.f32.xlu2 %v2752_v44 }
 0x3a4   : > { %v1267_v50 = vadd.f32 %v1933_v19, %v1266_v55  ;;  %1938 = vpow2.f32 %v1073_v63 }
 0x3a5   : > { %v1937_v4 = vpop.eup %1936 }
 0x3a6   : > { %v1271_v5 = vsel %vm1270_vm3, %v1933_v19, %v1267_v50  ;;  %v1278_v47 = vmul.f32 %v1937_v4, %v1106_v45  ;;  %v1108_v22 = vpop.xlane.xlu0 %1107  ;;  %vm1283_vm5 = vweird.f32 %v1937_v4 }
 0x3a7   : > { %v1276_v26 = vsel %vm1273_vm4, %v1275_v7, %v1271_v5  ;;  %1940 = vrcp.f32 %v1108_v22  ;;  %v980_v6 = vpop.xlane.xlu2 %979  ;;  %vm1284_vm7 = vmor %vm1282_vm6, %vm1283_vm5  ;;  %v1302_v33 = vand.u32 2147483648, %v1108_v22  ;;  %v1300_v19 = vand.u32 2147483647, %v1108_v22 }
 0x3a8   : > { %v1607_v58 = vmul.f32 %v2622_v16, %v1276_v26  ;;  %v1279_v11 = vsub.f32 1.0, %v1278_v47  ;;  %v1017_v13 = vsub.f32 %v2646_v34, %v980_v6  ;;  %v1289_v16 = vor.u32 1.1754944e-38, %v1288_v30 }
 0x3a9   : > { %vm1296_vm10 = vweird.f32 %v1108_v22  ;;  %v1303_v18 = vor.u32 1.1754944e-38, %v1302_v33  ;;  %vm1301_vm12 = vcmp.eq.f32.partialorder %v1300_v19, 8.507059e+37 }
 0x3aa   : > { %v2758_v12 = vpop.eup %1938  ;;  %1639 = vst [vmem:[%s2705_s18 + $0x40] sm:$0xff] %v1607_v58  ;;  %v1280_v53 = vmul.f32 %v1937_v4, %v1279_v11  ;;  %v1075_v10 = vmul.f32 1.442695, %v1017_v13 }
 0x3ab   : > { %1137 = vadd.xlane.f32.xlu0 %v2758_v12 }
 0x3ac   : > { %v1281_v17 = vadd.f32 %v1937_v4, %v1280_v53  ;;  %1942 = vpow2.f32 %v1075_v10 }
 0x3ad   : > { %v1941_v21 = vpop.eup %1940 }
 0x3ae   : > { %v1285_v42 = vsel %vm1284_vm7, %v1937_v4, %v1281_v17  ;;  %v1292_v34 = vmul.f32 %v1941_v21, %v1108_v22  ;;  %vm1297_vm9 = vweird.f32 %v1941_v21 }
 0x3af   : > { %v1290_v14 = vsel %vm1287_vm8, %v1289_v16, %v1285_v42  ;;  %v982_v2 = vpop.xlane.xlu0 %981  ;;  %vm1298_vm11 = vmor %vm1296_vm10, %vm1297_vm9 }
 0x3b0   : > { %v1608_v25 = vmul.f32 %v2632_v24, %v1290_v14  ;;  %v1293_v36 = vsub.f32 1.0, %v1292_v34  ;;  %v1018_v56 = vsub.f32 %v2652_v37, %v982_v2 }
 0x3b2   : > { %v2764_v54 = vpop.eup %1942  ;;  %1640 = vst [vmem:[%s2705_s18 + $0x48] sm:$0xff] %v1608_v25  ;;  %v1294_v40 = vmul.f32 %v1941_v21, %v1293_v36  ;;  %v1077_v62 = vmul.f32 1.442695, %v1018_v56 }
 0x3b3   : > { %1139 = vadd.xlane.f32.xlu1 %v2764_v54 }
 0x3b4   : > { %v1295_v38 = vadd.f32 %v1941_v21, %v1294_v40  ;;  %1944 = vpow2.f32 %v1077_v62 }
 0x3b6   : > { %v1299_v24 = vsel %vm1298_vm11, %v1941_v21, %v1295_v38 }
 0x3b7   : > { %v1304_v45 = vsel %vm1301_vm12, %v1303_v18, %v1299_v24  ;;  %v984_v37 = vpop.xlane.xlu1 %983 }
 0x3b8   : > { %v1609_v0 = vmul.f32 %v2641_v32, %v1304_v45  ;;  %v1019_v49 = vsub.f32 %v2658_v48, %v984_v37 }
 0x3ba   : > { %v2770_v52 = vpop.eup %1944  ;;  %1641 = vst [vmem:[%s2705_s18 + $0x50] sm:$0xff] %v1609_v0  ;;  %v1079_v3 = vmul.f32 1.442695, %v1019_v49 }
 0x3bb   : > { %1141 = vadd.xlane.f32.xlu2 %v2770_v52 }
 0x3bc   : > { %1946 = vpow2.f32 %v1079_v3 }
 0x3bf   : > { %v986_v60 = vpop.xlane.xlu2 %985 }
 0x3c0   : > { %v1020_v61 = vsub.f32 %v2665_v59, %v986_v60 }
 0x3c2   : > { %v2775_v55 = vpop.eup %1946  ;;  %v1081_v1 = vmul.f32 1.442695, %v1020_v61 }
 0x3c3   : > { %1143 = vadd.xlane.f32.xlu0 %v2775_v55 }
 0x3c4   : > { %1948 = vpow2.f32 %v1081_v1 }
 0x3c7   : > { %v1112_v63 = vpop.xlane.xlu2 %1111  ;;  %v988_v32 = vpop.xlane.xlu0 %987 }
 0x3c8   : > { %1950 = vrcp.f32 %v1112_v63  ;;  %v1021_v48 = vsub.f32 %v2675_v8, %v988_v32  ;;  %v1330_v58 = vand.u32 2147483648, %v1112_v63  ;;  %v1328_v30 = vand.u32 2147483647, %v1112_v63 }
 0x3c9   : > { %vm1324_vm14 = vweird.f32 %v1112_v63 }
 0x3ca   : > { %v2779_v50 = vpop.eup %1948  ;;  %v1083_v4 = vmul.f32 1.442695, %v1021_v48  ;;  %v1331_v10 = vor.u32 1.1754944e-38, %v1330_v58  ;;  %vm1329_vm0 = vcmp.eq.f32.partialorder %v1328_v30, 8.507059e+37 }
 0x3cb   : > { %1145 = vadd.xlane.f32.xlu1 %v2779_v50 }
 0x3cc   : > { %1952 = vpow2.f32 %v1083_v4 }
 0x3ce   : > { %v1951_v7 = vpop.eup %1950 }
 0x3cf   : > { %v1320_v5 = vmul.f32 %v1951_v7, %v1112_v63  ;;  %v990_v59 = vpop.xlane.xlu1 %989  ;;  %v1114_v47 = vpop.xlane.xlu0 %1113  ;;  %vm1325_vm13 = vweird.f32 %v1951_v7 }
 0x3d0   : > { %v1022_v22 = vsub.f32 %v2688_v27, %v990_v59  ;;  %v1118_v26 = vpop.xlane.xlu2 %1117  ;;  %1954 = vrcp.f32 %v1114_v47  ;;  %vm1326_vm15 = vmor %vm1324_vm14, %vm1325_vm13  ;;  %v1344_v33 = vand.u32 2147483648, %v1114_v47  ;;  %v1342_v62 = vand.u32 2147483647, %v1114_v47 }
 0x3d1   : > { %v1321_v6 = vsub.f32 1.0, %v1320_v5  ;;  %1956 = vrcp.f32 %v1118_v26  ;;  %v1372_v40 = vand.u32 2147483648, %v1118_v26  ;;  %v1370_v18 = vand.u32 2147483647, %v1118_v26 }
 0x3d2   : > { %v1085_v11 = vmul.f32 1.442695, %v1022_v22  ;;  %v2783_v13 = vpop.eup %1952  ;;  %vm1338_vm3 = vweird.f32 %v1114_v47  ;;  %vm1366_vm4 = vweird.f32 %v1118_v26  ;;  %v1345_v37 = vor.u32 1.1754944e-38, %v1344_v33 }
 0x3d3   : > { %v1322_v8 = vmul.f32 %v1951_v7, %v1321_v6  ;;  %1147 = vadd.xlane.f32.xlu2 %v2783_v13  ;;  %v1373_v0 = vor.u32 1.1754944e-38, %v1372_v40  ;;  %vm1343_vm7 = vcmp.eq.f32.partialorder %v1342_v62, 8.507059e+37  ;;  %vm1371_vm8 = vcmp.eq.f32.partialorder %v1370_v18, 8.507059e+37 }
 0x3d4   : > { %1958 = vpow2.f32 %v1085_v11 }
 0x3d5   : > { %v1323_v53 = vadd.f32 %v1951_v7, %v1322_v8 }
 0x3d6   : > { %v1955_v35 = vpop.eup %1954 }
 0x3d7   : > { %v1957_v27 = vpop.eup %1956  ;;  %v1327_v17 = vsel %vm1326_vm15, %v1951_v7, %v1323_v53  ;;  %v1334_v21 = vmul.f32 %v1955_v35, %v1114_v47  ;;  %v2786_v16 = vpop.xlane.xlu1 %1109  ;;  %vm1339_vm1 = vweird.f32 %v1955_v35 }
 0x3d8   : > { %v2788_v42 = vpop.xlane.xlu0 %1119  ;;  %v1332_v34 = vsel %vm1329_vm0, %v1331_v10, %v1327_v17  ;;  %v1362_v14 = vmul.f32 %v1957_v27, %v1118_v26  ;;  %1960 = vrcp.f32 %v2786_v16  ;;  %vm1367_vm2 = vweird.f32 %v1957_v27  ;;  %vm1340_vm5 = vmor %vm1338_vm3, %vm1339_vm1 }
 0x3d9   : > { %v1611_v2 = vmul.f32 %v2671_v15, %v1332_v34  ;;  %v1335_v25 = vsub.f32 1.0, %v1334_v21  ;;  %1962 = vrcp.f32 %v2788_v42  ;;  %vm1368_vm6 = vmor %vm1366_vm4, %vm1367_vm2  ;;  %v1316_v59 = vand.u32 2147483648, %v2786_v16 }
 0x3da   : > { %v2792_v36 = vpop.eup %1958  ;;  %v1363_v56 = vsub.f32 1.0, %v1362_v14  ;;  %v1314_v22 = vand.u32 2147483647, %v2786_v16  ;;  %vm1310_vm10 = vweird.f32 %v2786_v16  ;;  %v1386_v6 = vand.u32 2147483648, %v2788_v42 }
 0x3db   : > { %1643 = vst [vmem:[%s2705_s18 + $0x60] sm:$0xff] %v1611_v2  ;;  %v1336_v19 = vmul.f32 %v1955_v35, %v1335_v25  ;;  %1149 = vadd.xlane.f32.xlu0 %v2792_v36  ;;  %v1384_v11 = vand.u32 2147483647, %v2788_v42  ;;  %vm1380_vm13 = vweird.f32 %v2788_v42 }
 0x3dc   : > { %v1364_v38 = vmul.f32 %v1957_v27, %v1363_v56  ;;  %vm1315_vm14 = vcmp.eq.f32.partialorder %v1314_v22, 8.507059e+37  ;;  %v1387_v21 = vor.u32 1.1754944e-38, %v1386_v6 }
 0x3dd   : > { %v1337_v24 = vadd.f32 %v1955_v35, %v1336_v19  ;;  %vm1385_vm0 = vcmp.eq.f32.partialorder %v1384_v11, 8.507059e+37 }
 0x3de   : > { %v1961_v15 = vpop.eup %1960  ;;  %v1365_v45 = vadd.f32 %v1957_v27, %v1364_v38 }
 0x3df   : > { %v1341_v49 = vsel %vm1340_vm5, %v1955_v35, %v1337_v24  ;;  %v1306_v3 = vmul.f32 %v1961_v15, %v2786_v16  ;;  %v1116_v60 = vpop.xlane.xlu1 %1115  ;;  %v1963_v61 = vpop.eup %1962  ;;  %vm1311_vm9 = vweird.f32 %v1961_v15 }
 0x3e0   : > { %v1369_v1 = vsel %vm1368_vm6, %v1957_v27, %v1365_v45  ;;  %v1346_v63 = vsel %vm1343_vm7, %v1345_v37, %v1341_v49  ;;  %1964 = vrcp.f32 %v1116_v60  ;;  %v1376_v7 = vmul.f32 %v1963_v61, %v2788_v42  ;;  %vm1312_vm12 = vmor %vm1310_vm10, %vm1311_vm9 }
 0x3e1   : > { %v1374_v32 = vsel %vm1371_vm8, %v1373_v0, %v1369_v1  ;;  %v1612_v48 = vmul.f32 %v2684_v23, %v1346_v63  ;;  %v1307_v4 = vsub.f32 1.0, %v1306_v3  ;;  %vm1381_vm11 = vweird.f32 %v1963_v61 }
 0x3e2   : > { %v1614_v5 = vmul.f32 %v2682_v41, %v1374_v32  ;;  %v1377_v26 = vsub.f32 1.0, %v1376_v7  ;;  %v1317_v41 = vor.u32 1.1754944e-38, %v1316_v59  ;;  %vm1382_vm15 = vmor %vm1380_vm13, %vm1381_vm11  ;;  %v1358_v25 = vand.u32 2147483648, %v1116_v60 }
 0x3e3   : > { %1644 = vst [vmem:[%s2705_s18 + $0x68] sm:$0xff] %v1612_v48  ;;  %v1308_v47 = vmul.f32 %v1961_v15, %v1307_v4  ;;  %v1356_v33 = vand.u32 2147483647, %v1116_v60  ;;  %vm1352_vm2 = vweird.f32 %v1116_v60 }
 0x3e4   : > { %1646 = vst [vmem:[%s2705_s18 + $0x78] sm:$0xff] %v1614_v5  ;;  %v1378_v23 = vmul.f32 %v1963_v61, %v1377_v26  ;;  %v1359_v62 = vor.u32 1.1754944e-38, %v1358_v25 }
 0x3e5   : > { %v1309_v58 = vadd.f32 %v1961_v15, %v1308_v47  ;;  %vm1357_vm4 = vcmp.eq.f32.partialorder %v1356_v33, 8.507059e+37 }
 0x3e6   : > { %v1965_v8 = vpop.eup %1964  ;;  %v1124_v30 = vpop.xlane.xlu2 %1123  ;;  %v1379_v35 = vadd.f32 %v1963_v61, %v1378_v23 }
 0x3e7   : > { %v1313_v53 = vsel %vm1312_vm12, %v1961_v15, %v1309_v58  ;;  %v1348_v10 = vmul.f32 %v1965_v8, %v1116_v60  ;;  %v1122_v27 = vpop.xlane.xlu1 %1121  ;;  %1966 = vrcp.f32 %v1124_v30  ;;  %vm1353_vm1 = vweird.f32 %v1965_v8 }
 0x3e8   : > { %v1318_v17 = vsel %vm1315_vm14, %v1317_v41, %v1313_v53  ;;  %v1383_v34 = vsel %vm1382_vm15, %v1963_v61, %v1379_v35  ;;  %1968 = vrcp.f32 %v1122_v27  ;;  %vm1354_vm3 = vmor %vm1352_vm2, %vm1353_vm1  ;;  %v1412_v0 = vand.u32 2147483647, %v1124_v30 }
 0x3e9   : > { %v1610_v16 = vmul.f32 %v2696_v43, %v1318_v17  ;;  %v1349_v14 = vsub.f32 1.0, %v1348_v10  ;;  %v1388_v2 = vsel %vm1385_vm0, %v1387_v21, %v1383_v34  ;;  %v1414_v49 = vand.u32 2147483648, %v1124_v30 }
 0x3ea   : > { %v1615_v42 = vmul.f32 %v2694_v29, %v1388_v2  ;;  %vm1408_vm6 = vweird.f32 %v1124_v30  ;;  %v1400_v61 = vand.u32 2147483648, %v1122_v27  ;;  %v1398_v48 = vand.u32 2147483647, %v1122_v27 }
 0x3eb   : > { %1642 = vst [vmem:[%s2705_s18 + $0x58] sm:$0xff] %v1610_v16  ;;  %v1350_v56 = vmul.f32 %v1965_v8, %v1349_v14  ;;  %vm1413_vm9 = vcmp.eq.f32.partialorder %v1412_v0, 8.507059e+37  ;;  %v1415_v4 = vor.u32 1.1754944e-38, %v1414_v49  ;;  %vm1394_vm10 = vweird.f32 %v1122_v27 }
 0x3ec   : > { %1647 = vst [vmem:[%s2705_s18 + $0x80] sm:$0xff] %v1615_v42  ;;  %v1401_v22 = vor.u32 1.1754944e-38, %v1400_v61  ;;  %vm1399_vm12 = vcmp.eq.f32.partialorder %v1398_v48, 8.507059e+37 }
 0x3ed   : > { %v1351_v40 = vadd.f32 %v1965_v8, %v1350_v56  ;;  %v1967_v19 = vpop.eup %1966 }
 0x3ee   : > { %v1126_v43 = vpop.xlane.xlu0 %1125  ;;  %v1404_v18 = vmul.f32 %v1967_v19, %v1124_v30  ;;  %v1969_v24 = vpop.eup %1968  ;;  %vm1409_vm5 = vweird.f32 %v1967_v19 }
 0x3ef   : > { %v1355_v38 = vsel %vm1354_vm3, %v1965_v8, %v1351_v40  ;;  %1970 = vrcp.f32 %v1126_v43  ;;  %v1390_v37 = vmul.f32 %v1969_v24, %v1122_v27  ;;  %vm1395_vm7 = vweird.f32 %v1969_v24  ;;  %vm1410_vm8 = vmor %vm1408_vm6, %vm1409_vm5 }
 0x3f0   : > { %v1360_v15 = vsel %vm1357_vm4, %v1359_v62, %v1355_v38  ;;  %v1405_v29 = vsub.f32 1.0, %v1404_v18  ;;  %vm1396_vm11 = vmor %vm1394_vm10, %vm1395_vm7  ;;  %v1428_v23 = vand.u32 2147483648, %v1126_v43  ;;  %v1426_v41 = vand.u32 2147483647, %v1126_v43 }
 0x3f1   : > { %v1613_v45 = vmul.f32 %v2708_v57, %v1360_v15  ;;  %v1391_v60 = vsub.f32 1.0, %v1390_v37  ;;  %vm1422_vm14 = vweird.f32 %v1126_v43 }
 0x3f2   : > { %v1406_v3 = vmul.f32 %v1967_v19, %v1405_v29  ;;  %v1429_v10 = vor.u32 1.1754944e-38, %v1428_v23  ;;  %vm1427_vm0 = vcmp.eq.f32.partialorder %v1426_v41, 8.507059e+37 }
 0x3f3   : > { %1645 = vst [vmem:[%s2705_s18 + $0x70] sm:$0xff] %v1613_v45  ;;  %v1392_v32 = vmul.f32 %v1969_v24, %v1391_v60 }
 0x3f4   : > { %v1407_v63 = vadd.f32 %v1967_v19, %v1406_v3 }
 0x3f5   : > { %v1971_v1 = vpop.eup %1970  ;;  %v1393_v59 = vadd.f32 %v1969_v24, %v1392_v32 }
 0x3f6   : > { %v1418_v7 = vmul.f32 %v1971_v1, %v1126_v43  ;;  %v1128_v57 = vpop.xlane.xlu1 %1127  ;;  %v1411_v5 = vsel %vm1410_vm8, %v1967_v19, %v1407_v63  ;;  %vm1423_vm13 = vweird.f32 %v1971_v1 }
 0x3f7   : > { %1972 = vrcp.f32 %v1128_v57  ;;  %v1416_v47 = vsel %vm1413_vm9, %v1415_v4, %v1411_v5  ;;  %v1397_v58 = vsel %vm1396_vm11, %v1969_v24, %v1393_v59  ;;  %vm1424_vm15 = vmor %vm1422_vm14, %vm1423_vm13  ;;  %v1442_v14 = vand.u32 2147483648, %v1128_v57 }
 0x3f8   : > { %v1419_v26 = vsub.f32 1.0, %v1418_v7  ;;  %v1617_v6 = vmul.f32 %v2713_v28, %v1416_v47  ;;  %v1402_v11 = vsel %vm1399_vm12, %v1401_v22, %v1397_v58  ;;  %vm1436_vm2 = vweird.f32 %v1128_v57 }
 0x3f9   : > { %v1616_v30 = vmul.f32 %v2716_v39, %v1402_v11  ;;  %v1440_v39 = vand.u32 2147483647, %v1128_v57  ;;  %v1443_v56 = vor.u32 1.1754944e-38, %v1442_v14 }
 0x3fa   : > { %v1420_v8 = vmul.f32 %v1971_v1, %v1419_v26  ;;  %1649 = vst [vmem:[%s2705_s18 + $0x90] sm:$0xff] %v1617_v6 }
 0x3fb   : > { %1648 = vst [vmem:[%s2705_s18 + $0x88] sm:$0xff] %v1616_v30  ;;  %vm1441_vm4 = vcmp.eq.f32.partialorder %v1440_v39, 8.507059e+37 }
 0x3fc   : > { %v1421_v53 = vadd.f32 %v1971_v1, %v1420_v8 }
 0x3fd   : > { %v1973_v35 = vpop.eup %1972 }
 0x3fe   : > { %v1425_v27 = vsel %vm1424_vm15, %v1971_v1, %v1421_v53  ;;  %v1432_v28 = vmul.f32 %v1973_v35, %v1128_v57  ;;  %v1130_v17 = vpop.xlane.xlu2 %1129  ;;  %vm1437_vm1 = vweird.f32 %v1973_v35 }
 0x3ff   : > { %v1430_v21 = vsel %vm1427_vm0, %v1429_v10, %v1425_v27  ;;  %1974 = vrcp.f32 %v1130_v17  ;;  %vm1438_vm3 = vmor %vm1436_vm2, %vm1437_vm1  ;;  %v1456_v38 = vand.u32 2147483648, %v1130_v17  ;;  %v1454_v24 = vand.u32 2147483647, %v1130_v17 }
 0x400   : > { %v1618_v16 = vmul.f32 %v2722_v9, %v1430_v21  ;;  %v1433_v34 = vsub.f32 1.0, %v1432_v28  ;;  %vm1450_vm6 = vweird.f32 %v1130_v17 }
 0x401   : > { %v1457_v29 = vor.u32 1.1754944e-38, %v1456_v38  ;;  %vm1455_vm8 = vcmp.eq.f32.partialorder %v1454_v24, 8.507059e+37 }
 0x402   : > { %1650 = vst [vmem:[%s2705_s18 + $0x98] sm:$0xff] %v1618_v16  ;;  %v1434_v2 = vmul.f32 %v1973_v35, %v1433_v34 }
 0x404   : > { %v1435_v25 = vadd.f32 %v1973_v35, %v1434_v2 }
 0x405   : > { %v1975_v42 = vpop.eup %1974 }
 0x406   : > { %v1439_v33 = vsel %vm1438_vm3, %v1973_v35, %v1435_v25  ;;  %v1446_v40 = vmul.f32 %v1975_v42, %v1130_v17  ;;  %v1132_v19 = vpop.xlane.xlu0 %1131  ;;  %vm1451_vm5 = vweird.f32 %v1975_v42 }
 0x407   : > { %v1444_v62 = vsel %vm1441_vm4, %v1443_v56, %v1439_v33  ;;  %1976 = vrcp.f32 %v1132_v19  ;;  %vm1452_vm7 = vmor %vm1450_vm6, %vm1451_vm5  ;;  %v1470_v61 = vand.u32 2147483648, %v1132_v19  ;;  %v1468_v63 = vand.u32 2147483647, %v1132_v19 }
 0x408   : > { %v1619_v9 = vmul.f32 %v2728_v20, %v1444_v62  ;;  %v1447_v43 = vsub.f32 1.0, %v1446_v40  ;;  %vm1464_vm10 = vweird.f32 %v1132_v19 }
 0x409   : > { %v1471_v4 = vor.u32 1.1754944e-38, %v1470_v61  ;;  %vm1469_vm12 = vcmp.eq.f32.partialorder %v1468_v63, 8.507059e+37 }
 0x40a   : > { %1651 = vst [vmem:[%s2705_s18 + $0xa0] sm:$0xff] %v1619_v9  ;;  %v1448_v18 = vmul.f32 %v1975_v42, %v1447_v43 }
 0x40c   : > { %v1449_v15 = vadd.f32 %v1975_v42, %v1448_v18 }
 0x40d   : > { %v1977_v45 = vpop.eup %1976 }
 0x40e   : > { %v1453_v37 = vsel %vm1452_vm7, %v1975_v42, %v1449_v15  ;;  %v1460_v0 = vmul.f32 %v1977_v45, %v1132_v19  ;;  %v1134_v49 = vpop.xlane.xlu1 %1133  ;;  %vm1465_vm9 = vweird.f32 %v1977_v45 }
 0x40f   : > { %v1458_v3 = vsel %vm1455_vm8, %v1457_v29, %v1453_v37  ;;  %1978 = vrcp.f32 %v1134_v49  ;;  %vm1466_vm11 = vmor %vm1464_vm10, %vm1465_vm9  ;;  %v1484_v22 = vand.u32 2147483648, %v1134_v49  ;;  %v1482_v6 = vand.u32 2147483647, %v1134_v49 }
 0x410   : > { %v1620_v20 = vmul.f32 %v2734_v51, %v1458_v3  ;;  %v1461_v60 = vsub.f32 1.0, %v1460_v0  ;;  %vm1478_vm14 = vweird.f32 %v1134_v49 }
 0x411   : > { %v1485_v11 = vor.u32 1.1754944e-38, %v1484_v22  ;;  %vm1483_vm0 = vcmp.eq.f32.partialorder %v1482_v6, 8.507059e+37 }
 0x412   : > { %1652 = vst [vmem:[%s2705_s18 + $0xa8] sm:$0xff] %v1620_v20  ;;  %v1462_v1 = vmul.f32 %v1977_v45, %v1461_v60 }
 0x414   : > { %v1463_v32 = vadd.f32 %v1977_v45, %v1462_v1 }
 0x415   : > { %v1979_v48 = vpop.eup %1978 }
 0x416   : > { %v1467_v7 = vsel %vm1466_vm11, %v1977_v45, %v1463_v32  ;;  %v1474_v57 = vmul.f32 %v1979_v48, %v1134_v49  ;;  %v1136_v5 = vpop.xlane.xlu2 %1135  ;;  %vm1479_vm13 = vweird.f32 %v1979_v48 }
 0x417   : > { %v1472_v59 = vsel %vm1469_vm12, %v1471_v4, %v1467_v7  ;;  %1980 = vrcp.f32 %v1136_v5  ;;  %vm1480_vm15 = vmor %vm1478_vm14, %vm1479_vm13  ;;  %v1498_v10 = vand.u32 2147483648, %v1136_v5  ;;  %v1496_v28 = vand.u32 2147483647, %v1136_v5 }
 0x418   : > { %v1621_v51 = vmul.f32 %v2740_v46, %v1472_v59  ;;  %v1475_v47 = vsub.f32 1.0, %v1474_v57  ;;  %vm1492_vm2 = vweird.f32 %v1136_v5 }
 0x419   : > { %v1499_v16 = vor.u32 1.1754944e-38, %v1498_v10  ;;  %vm1497_vm4 = vcmp.eq.f32.partialorder %v1496_v28, 8.507059e+37 }
 0x41a   : > { %1653 = vst [vmem:[%s2705_s18 + $0xb0] sm:$0xff] %v1621_v51  ;;  %v1476_v26 = vmul.f32 %v1979_v48, %v1475_v47 }
 0x41c   : > { %v1477_v58 = vadd.f32 %v1979_v48, %v1476_v26 }
 0x41d   : > { %v1981_v23 = vpop.eup %1980 }
 0x41e   : > { %v1481_v8 = vsel %vm1480_vm15, %v1979_v48, %v1477_v58  ;;  %v1488_v41 = vmul.f32 %v1981_v23, %v1136_v5  ;;  %v1138_v30 = vpop.xlane.xlu0 %1137  ;;  %vm1493_vm1 = vweird.f32 %v1981_v23 }
 0x41f   : > { %v1486_v53 = vsel %vm1483_vm0, %v1485_v11, %v1481_v8  ;;  %1982 = vrcp.f32 %v1138_v30  ;;  %vm1494_vm3 = vmor %vm1492_vm2, %vm1493_vm1  ;;  %v1512_v42 = vand.u32 2147483648, %v1138_v30  ;;  %v1510_v33 = vand.u32 2147483647, %v1138_v30 }
 0x420   : > { %v1622_v46 = vmul.f32 %v2746_v31, %v1486_v53  ;;  %v1489_v35 = vsub.f32 1.0, %v1488_v41  ;;  %vm1506_vm6 = vweird.f32 %v1138_v30 }
 0x421   : > { %v1513_v62 = vor.u32 1.1754944e-38, %v1512_v42  ;;  %vm1511_vm8 = vcmp.eq.f32.partialorder %v1510_v33, 8.507059e+37 }
 0x422   : > { %1654 = vst [vmem:[%s2705_s18 + $0xb8] sm:$0xff] %v1622_v46  ;;  %v1490_v27 = vmul.f32 %v1981_v23, %v1489_v35 }
 0x424   : > { %v1491_v17 = vadd.f32 %v1981_v23, %v1490_v27 }
 0x425   : > { %v1983_v21 = vpop.eup %1982 }
 0x426   : > { %v1495_v34 = vsel %vm1494_vm3, %v1981_v23, %v1491_v17  ;;  %v1502_v14 = vmul.f32 %v1983_v21, %v1138_v30  ;;  %v1140_v2 = vpop.xlane.xlu1 %1139  ;;  %vm1507_vm5 = vweird.f32 %v1983_v21 }
 0x427   : > { %v1500_v39 = vsel %vm1497_vm4, %v1499_v16, %v1495_v34  ;;  %1984 = vrcp.f32 %v1140_v2  ;;  %vm1508_vm7 = vmor %vm1506_vm6, %vm1507_vm5  ;;  %v1526_v15 = vand.u32 2147483648, %v1140_v2  ;;  %v1524_v29 = vand.u32 2147483647, %v1140_v2 }
 0x428   : > { %v1623_v31 = vmul.f32 %v2752_v44, %v1500_v39  ;;  %v1503_v25 = vsub.f32 1.0, %v1502_v14  ;;  %vm1520_vm10 = vweird.f32 %v1140_v2 }
 0x429   : > { %v1527_v49 = vor.u32 1.1754944e-38, %v1526_v15  ;;  %vm1525_vm12 = vcmp.eq.f32.partialorder %v1524_v29, 8.507059e+37 }
 0x42a   : > { %1655 = vst [vmem:[%s2705_s18 + $0xc0] sm:$0xff] %v1623_v31  ;;  %v1504_v56 = vmul.f32 %v1983_v21, %v1503_v25 }
 0x42c   : > { %v1505_v40 = vadd.f32 %v1983_v21, %v1504_v56 }
 0x42d   : > { %v1985_v19 = vpop.eup %1984 }
 0x42e   : > { %v1509_v9 = vsel %vm1508_vm7, %v1983_v21, %v1505_v40  ;;  %v1516_v43 = vmul.f32 %v1985_v19, %v1140_v2  ;;  %v1142_v38 = vpop.xlane.xlu2 %1141  ;;  %vm1521_vm9 = vweird.f32 %v1985_v19 }
 0x42f   : > { %v1514_v18 = vsel %vm1511_vm8, %v1513_v62, %v1509_v9  ;;  %1986 = vrcp.f32 %v1142_v38  ;;  %vm1522_vm11 = vmor %vm1520_vm10, %vm1521_vm9  ;;  %v1540_v63 = vand.u32 2147483648, %v1142_v38  ;;  %v1538_v48 = vand.u32 2147483647, %v1142_v38 }
 0x430   : > { %v1624_v44 = vmul.f32 %v2758_v12, %v1514_v18  ;;  %v1517_v24 = vsub.f32 1.0, %v1516_v43  ;;  %vm1534_vm14 = vweird.f32 %v1142_v38 }
 0x431   : > { %v1541_v57 = vor.u32 1.1754944e-38, %v1540_v63  ;;  %vm1539_vm0 = vcmp.eq.f32.partialorder %v1538_v48, 8.507059e+37 }
 0x432   : > { %1656 = vst [vmem:[%s2705_s18 + $0xc8] sm:$0xff] %v1624_v44  ;;  %v1518_v45 = vmul.f32 %v1985_v19, %v1517_v24 }
 0x434   : > { %v1519_v37 = vadd.f32 %v1985_v19, %v1518_v45 }
 0x435   : > { %v1987_v0 = vpop.eup %1986 }
 0x436   : > { %v1523_v3 = vsel %vm1522_vm11, %v1985_v19, %v1519_v37  ;;  %v1530_v20 = vmul.f32 %v1987_v0, %v1142_v38  ;;  %v1144_v60 = vpop.xlane.xlu0 %1143  ;;  %vm1535_vm13 = vweird.f32 %v1987_v0 }
 0x437   : > { %v1528_v61 = vsel %vm1525_vm12, %v1527_v49, %v1523_v3  ;;  %1988 = vrcp.f32 %v1144_v60  ;;  %vm1536_vm15 = vmor %vm1534_vm14, %vm1535_vm13  ;;  %v1554_v26 = vand.u32 2147483648, %v1144_v60  ;;  %v1552_v58 = vand.u32 2147483647, %v1144_v60 }
 0x438   : > { %v1625_v12 = vmul.f32 %v2764_v54, %v1528_v61  ;;  %v1531_v1 = vsub.f32 1.0, %v1530_v20  ;;  %vm1548_vm2 = vweird.f32 %v1144_v60 }
 0x439   : > { %v1555_v8 = vor.u32 1.1754944e-38, %v1554_v26  ;;  %vm1553_vm4 = vcmp.eq.f32.partialorder %v1552_v58, 8.507059e+37 }
 0x43a   : > { %1657 = vst [vmem:[%s2705_s18 + $0xd0] sm:$0xff] %v1625_v12  ;;  %v1532_v32 = vmul.f32 %v1987_v0, %v1531_v1 }
 0x43c   : > { %v1533_v4 = vadd.f32 %v1987_v0, %v1532_v32 }
 0x43d   : > { %v1989_v7 = vpop.eup %1988 }
 0x43e   : > { %v1537_v5 = vsel %vm1536_vm15, %v1987_v0, %v1533_v4  ;;  %v1544_v59 = vmul.f32 %v1989_v7, %v1144_v60  ;;  %v1146_v51 = vpop.xlane.xlu1 %1145  ;;  %vm1549_vm1 = vweird.f32 %v1989_v7 }
 0x43f   : > { %v1542_v47 = vsel %vm1539_vm0, %v1541_v57, %v1537_v5  ;;  %1990 = vrcp.f32 %v1146_v51  ;;  %vm1550_vm3 = vmor %vm1548_vm2, %vm1549_vm1  ;;  %v1568_v10 = vand.u32 2147483648, %v1146_v51  ;;  %v1566_v28 = vand.u32 2147483647, %v1146_v51 }
 0x440   : > { %v1626_v54 = vmul.f32 %v2770_v52, %v1542_v47  ;;  %v1545_v22 = vsub.f32 1.0, %v1544_v59  ;;  %vm1562_vm6 = vweird.f32 %v1146_v51 }
 0x441   : > { %v1569_v21 = vor.u32 1.1754944e-38, %v1568_v10  ;;  %vm1567_vm8 = vcmp.eq.f32.partialorder %v1566_v28, 8.507059e+37 }
 0x442   : > { %1658 = vst [vmem:[%s2705_s18 + $0xd8] sm:$0xff] %v1626_v54  ;;  %v1546_v6 = vmul.f32 %v1989_v7, %v1545_v22 }
 0x444   : > { %v1547_v23 = vadd.f32 %v1989_v7, %v1546_v6 }
 0x445   : > { %v1991_v11 = vpop.eup %1990 }
 0x446   : > { %v1551_v41 = vsel %vm1550_vm3, %v1989_v7, %v1547_v23  ;;  %v1558_v30 = vmul.f32 %v1991_v11, %v1146_v51  ;;  %v1148_v46 = vpop.xlane.xlu2 %1147  ;;  %vm1563_vm5 = vweird.f32 %v1991_v11 }
 0x447   : > { %v1556_v53 = vsel %vm1553_vm4, %v1555_v8, %v1551_v41  ;;  %1992 = vrcp.f32 %v1148_v46  ;;  %vm1564_vm7 = vmor %vm1562_vm6, %vm1563_vm5  ;;  %v1582_v25 = vand.u32 2147483648, %v1148_v46  ;;  %v1580_v56 = vand.u32 2147483647, %v1148_v46 }
 0x448   : > { %v1627_v35 = vmul.f32 %v2775_v55, %v1556_v53  ;;  %v1559_v52 = vsub.f32 1.0, %v1558_v30  ;;  %vm1576_vm10 = vweird.f32 %v1148_v46 }
 0x449   : > { %v1583_v19 = vor.u32 1.1754944e-38, %v1582_v25  ;;  %vm1581_vm12 = vcmp.eq.f32.partialorder %v1580_v56, 8.507059e+37 }
 0x44a   : > { %1659 = vst [vmem:[%s2705_s18 + $0xe0] sm:$0xff] %v1627_v35  ;;  %v1560_v27 = vmul.f32 %v1991_v11, %v1559_v52 }
 0x44c   : > { %v1561_v17 = vadd.f32 %v1991_v11, %v1560_v27 }
 0x44d   : > { %v1993_v16 = vpop.eup %1992 }
 0x44e   : > { %v1565_v34 = vsel %vm1564_vm7, %v1991_v11, %v1561_v17  ;;  %v1150_v14 = vpop.xlane.xlu0 %1149  ;;  %v1572_v39 = vmul.f32 %v1993_v16, %v1148_v46  ;;  %vm1577_vm9 = vweird.f32 %v1993_v16 }
 0x44f   : > { %v1570_v2 = vsel %vm1567_vm8, %v1569_v21, %v1565_v34  ;;  %1994 = vrcp.f32 %v1150_v14  ;;  %vm1578_vm11 = vmor %vm1576_vm10, %vm1577_vm9  ;;  %v1596_v18 = vand.u32 2147483648, %v1150_v14  ;;  %v1594_v24 = vand.u32 2147483647, %v1150_v14 }
 0x450   : > { %v1628_v55 = vmul.f32 %v2779_v50, %v1570_v2  ;;  %v1573_v31 = vsub.f32 1.0, %v1572_v39  ;;  %vm1590_vm14 = vweird.f32 %v1150_v14 }
 0x451   : > { %v1597_v45 = vor.u32 1.1754944e-38, %v1596_v18  ;;  %vm1595_vm0 = vcmp.eq.f32.partialorder %v1594_v24, 8.507059e+37 }
 0x452   : > { %1660 = vst [vmem:[%s2705_s18 + $0xe8] sm:$0xff] %v1628_v55  ;;  %v1574_v42 = vmul.f32 %v1993_v16, %v1573_v31 }
 0x454   : > { %v1575_v40 = vadd.f32 %v1993_v16, %v1574_v42 }
 0x455   : > { %v1995_v33 = vpop.eup %1994 }
 0x456   : > { %v1586_v62 = vmul.f32 %v1995_v33, %v1150_v14  ;;  %v1579_v9 = vsel %vm1578_vm11, %v1993_v16, %v1575_v40  ;;  %vm1591_vm13 = vweird.f32 %v1995_v33 }
 0x457   : > { %v1584_v43 = vsel %vm1581_vm12, %v1583_v19, %v1579_v9  ;;  %vm1592_vm15 = vmor %vm1590_vm14, %vm1591_vm13 }
 0x458   : > { %v1587_v38 = vsub.f32 1.0, %v1586_v62  ;;  %v1629_v50 = vmul.f32 %v2783_v13, %v1584_v43 }
 0x45a   : > { %v1588_v44 = vmul.f32 %v1995_v33, %v1587_v38  ;;  %1661 = vst [vmem:[%s2705_s18 + $0xf0] sm:$0xff] %v1629_v50 }
 0x45c   : > { %v1589_v15 = vadd.f32 %v1995_v33, %v1588_v44 }
 0x45e   : > { %v1593_v29 = vsel %vm1592_vm15, %v1995_v33, %v1589_v15 }
 0x45f   : > { %v1598_v13 = vsel %vm1595_vm0, %v1597_v45, %v1593_v29 }
 0x460   : > { %v1630_v37 = vmul.f32 %v2792_v36, %v1598_v13 }
 0x462   : > { %1662 = vst [vmem:[%s2705_s18 + $0xf8] sm:$0xff] %v1630_v37 }
 0x463   : > { %2113 = shalt.err (!%p2110_p10)
}
 0x464   : > { %s2164_s20 = smov 128   ;;  %s2165_s26 = smov 8  }
 0x465   : > { %1801 = dma.vmem_to_hbm [thread:$0]  (%p2258_p5), %s1677_s16, 4096, %s1679_s4, %s1664_s5, %s2164_s20, %s2164_s20, %s2165_s26  }
 0x466 PF: > { %s1693_s27 = sand.u32 1, %s2144_s12   ;;  %p2888_p12 = scmp.ge.s32.totalorder %s2156_s15, 2 }
 0x467   : > { %s1694_s7 = scalar_lea.sflag [#allocation4], %s1693_s27 }
 0x468   : > { %p1815_p13 = pnand %p2888_p12, %p2221_p6 }
 0x46a   : > { %p1816_p0 = pneg %p1815_p13 }
 0x46c   : > { %2139 = dma.done.wait (%p1816_p0), %s1694_s7, 4096  }
 0x46d   : > { %2141 = vsyncadd (%p1816_p0), %s1694_s7, 4294963200  ;;  %p17_p3 = scmp.ge.s32.totalorder %s2245_s8, 4   ;;  %s2889_s12 = smov %s2148_s13 }
 0x46e   : > { %s2890_s13 = smov %s2152_s14  ;;  %s2891_s14 = smov %s2254_s11 }
 0x46f   : > { %s2892_s15 = smov %s2245_s8  ;;  %19 = sbr.rel (!%p17_p3) target bundleno = 6 (0x6), region = 91 }
 0x474   :  { %1700 = vsyncpa [#allocation3], 1 }
 0x475   :  { %1702 = vsyncpa [#allocation3 + $0x1], 1 }
 0x476   :  { %1703 = vsyncpa [#allocation6], 1 }
 0x477   :  { %1704 = vsyncpa [#allocation4], 1 }
 0x478   :  { %1706 = vsyncpa [#allocation4 + $0x1], 1 }

</bundles_post_ra>
